<compile_context>
chip_gen: v7x
topology: tpu7x:2x2x1
jax: 0.10.0
libtpu: 0.0.40
codegen_flags: <defaults>
</compile_context>

<pallas_src>
import functools

import jax
import jax.numpy as jnp
from jax import lax
from jax.experimental import pallas as pl
from jax.experimental.pallas import tpu as pltpu

EPS = 1e-5      # nn.BatchNorm2d default eps
LANES = 128


def _round_up(v, m):
    return (v + m - 1) // m * m


def _block_bytes(shape, dtype):
    """Rough VMEM footprint of one block (last two dims padded to the vreg tile)."""
    padded = list(shape)
    padded[-1] = _round_up(padded[-1], LANES)
    if len(padded) >= 2:
        padded[-2] = _round_up(padded[-2], 8)
    size = 1
    for d in padded:
        size *= d
    return size * jnp.dtype(dtype).itemsize


def _pick_spatial_tile(s_out):
    """Lane-dense pass-2 spatial tile: a divisor of OH*W that is a multiple of 128."""
    if s_out <= 4096 or s_out % LANES != 0:
        return s_out                      # full-extent block is always legal
    for ts in (4096, 2048, 1024, 512, 256, LANES):
        if s_out % ts == 0:
            return ts
    return s_out


# --------------------------------------------------------------------------
# Pass 1: implicit-GEMM conv (in-VMEM im2col, one matmul) + per-image stats.
# --------------------------------------------------------------------------
def _conv_stats_kernel(x_ref, w_ref, mask_ref, y_ref, sum_ref, sumsq_ref,
                       rhs_ref, *, shifts, ic, s_out):
    # x_ref:    (1, IC, S_in)       f32   one image, spatial flattened (lane-dense)
    # w_ref:    (OC_pad, K)         bf16  resident conv weight, K = KH*KW*IC
    # mask_ref: (1, S_out)          f32   1.0 on valid output columns, else 0.0
    # y_ref:    (1, OC_pad, S_out)  bf16  conv output for this image
    # sum_ref / sumsq_ref: (1, OC_pad, 1) f32  per-image partial BN statistics
    # rhs_ref:  (K, S_out)          f32   VMEM scratch: in-VMEM im2col
    for idx, shift in enumerate(shifts):            # static python ints -> unrolled
        rhs_ref[idx * ic:(idx + 1) * ic, :] = x_ref[0, :, pl.ds(shift, s_out)]

    rhs = rhs_ref[...].astype(jnp.bfloat16)         # cast each element exactly once
    y = jnp.dot(w_ref[...], rhs, preferred_element_type=jnp.float32)  # (OC_pad, S_out)
    y_ref[0] = y.astype(y_ref.dtype)

    # Per-image BN partials over VALID output columns only (the flattened-width
    # trick makes columns >= OW garbage; the precomputed mask is 0 there).
    yv = y * mask_ref[...]
    sum_ref[0] = jnp.sum(yv, axis=1, keepdims=True)
    sumsq_ref[0] = jnp.sum(yv * yv, axis=1, keepdims=True)


# --------------------------------------------------------------------------
# Pass 2: y * scale + shift, ReLU (pure streaming, fully parallel).
# --------------------------------------------------------------------------
def _bn_relu_kernel(y_ref, scale_ref, shift_ref, o_ref):
    y = y_ref[0].astype(jnp.float32)                                   # (OC_pad, TS)
    o_ref[0] = jnp.maximum(y * scale_ref[0] + shift_ref[0], 0.0).astype(o_ref.dtype)


# --------------------------------------------------------------------------
# Wrapper.
# --------------------------------------------------------------------------
def conv2d_block(x, weight, bias, gamma, beta, *, eps=EPS):
    """x: (N, IC, H, W), weight: (OC, IC, KH, KW). Returns (N, OC, OH, OW) f32."""
    del bias  # cancels exactly under training-mode BatchNorm (absorbed by the mean)

    n, ic, h, w_dim = x.shape
    oc, ic2, kh, kw = weight.shape
    assert ic == ic2
    oh, ow = h - kh + 1, w_dim - kw + 1
    oc_pad = _round_up(oc, LANES)
    k_dim = kh * kw * ic
    s_out = oh * w_dim                  # flattened output positions per image
    s_in = h * w_dim + (kw - 1)         # flattened input (+ tail pad so shifts stay in-bounds)
    count = n * oh * ow                 # valid positions per channel

    # NCHW -> (N, IC, H*W): spatial stays on the (lane-dense) minor axis, no transpose.
    x_flat = x.astype(jnp.float32).reshape(n, ic, h * w_dim)
    x_flat = jnp.pad(x_flat, ((0, 0), (0, 0), (0, s_in - h * w_dim)))

    # weight (OC, IC, KH, KW) -> (OC_pad, KH*KW*IC) bf16; contraction order (kh, kw, ic)
    # matches the im2col row order built inside the kernel.
    w_mat = jnp.transpose(weight, (0, 2, 3, 1)).reshape(oc, k_dim)
    w_mat = jnp.pad(w_mat, ((0, oc_pad - oc), (0, 0))).astype(jnp.bfloat16)

    # Grid-invariant validity mask, hoisted out of the kernel: columns >= OW of each
    # flattened output row come from windows that wrap across image rows.
    col = jnp.arange(s_out, dtype=jnp.int32) % w_dim
    mask = (col < ow).astype(jnp.float32).reshape(1, s_out)

    shifts = tuple(i * w_dim + j for i in range(kh) for j in range(kw))

    # ---- pass 1: conv + per-image partial stats ------------------------------
    vmem1 = 2 * (_block_bytes((1, ic, s_in), jnp.float32)
                 + _block_bytes((oc_pad, k_dim), jnp.bfloat16)
                 + _block_bytes((1, s_out), jnp.float32)
                 + _block_bytes((1, oc_pad, s_out), jnp.bfloat16)
                 + 2 * _block_bytes((1, oc_pad, 1), jnp.float32))
    vmem1 += _block_bytes((k_dim, s_out), jnp.float32)
    vmem1 = min(int(vmem1 * 1.5) + (2 << 20), 100 << 20)

    kernel1 = functools.partial(_conv_stats_kernel, shifts=shifts, ic=ic, s_out=s_out)
    y_bf16, part_sum, part_sumsq = pl.pallas_call(
        kernel1,
        grid=(n,),
        in_specs=[
            pl.BlockSpec((1, ic, s_in), lambda b: (b, 0, 0)),           # streamed image
            pl.BlockSpec((oc_pad, k_dim), lambda b: (0, 0)),            # resident weight
            pl.BlockSpec((1, s_out), lambda b: (0, 0)),                 # resident mask
        ],
        out_specs=(
            pl.BlockSpec((1, oc_pad, s_out), lambda b: (b, 0, 0)),
            pl.BlockSpec((1, oc_pad, 1), lambda b: (b, 0, 0)),
            pl.BlockSpec((1, oc_pad, 1), lambda b: (b, 0, 0)),
        ),
        out_shape=(
            jax.ShapeDtypeStruct((n, oc_pad, s_out), jnp.bfloat16),
            jax.ShapeDtypeStruct((n, oc_pad, 1), jnp.float32),
            jax.ShapeDtypeStruct((n, oc_pad, 1), jnp.float32),
        ),
        scratch_shapes=[pltpu.VMEM((k_dim, s_out), jnp.float32)],
        compiler_params=pltpu.CompilerParams(
            dimension_semantics=("parallel",), vmem_limit_bytes=vmem1),
    )(x_flat, w_mat, mask)

    # ---- BN scale/shift from global batch stats (tiny, plain JAX) ------------
    ch_sum = jnp.sum(part_sum, axis=0)                                  # (OC_pad, 1)
    ch_sumsq = jnp.sum(part_sumsq, axis=0)
    mean = ch_sum / count
    var = jnp.maximum(ch_sumsq / count - mean * mean, 0.0)
    inv_std = lax.rsqrt(var + eps)
    g_col = jnp.pad(gamma.astype(jnp.float32), (0, oc_pad - oc)).reshape(oc_pad, 1)
    b_col = jnp.pad(beta.astype(jnp.float32), (0, oc_pad - oc)).reshape(oc_pad, 1)
    scale = (g_col * inv_std).reshape(1, oc_pad, 1)
    shift = (b_col - mean * g_col * inv_std).reshape(1, oc_pad, 1)

    # ---- pass 2: normalize + ReLU --------------------------------------------
    ts = _pick_spatial_tile(s_out)
    vmem2 = 2 * (_block_bytes((1, oc_pad, ts), jnp.bfloat16)
                 + 2 * _block_bytes((1, oc_pad, 1), jnp.float32)
                 + _block_bytes((1, oc_pad, ts), jnp.float32))
    vmem2 = min(int(vmem2 * 1.5) + (2 << 20), 100 << 20)

    y_norm = pl.pallas_call(
        _bn_relu_kernel,
        grid=(n, s_out // ts),
        in_specs=[
            pl.BlockSpec((1, oc_pad, ts), lambda b, t: (b, 0, t)),
            pl.BlockSpec((1, oc_pad, 1), lambda b, t: (0, 0, 0)),
            pl.BlockSpec((1, oc_pad, 1), lambda b, t: (0, 0, 0)),
        ],
        out_specs=pl.BlockSpec((1, oc_pad, ts), lambda b, t: (b, 0, t)),
        out_shape=jax.ShapeDtypeStruct((n, oc_pad, s_out), jnp.float32),
        compiler_params=pltpu.CompilerParams(
            dimension_semantics=("parallel", "parallel"), vmem_limit_bytes=vmem2),
    )(y_bf16, scale, shift)

    # (N, OC_pad, OH*W) -> (N, OC_pad, OH, W) -> valid (N, OC, OH, OW).
    # Channel-first layout throughout, so no final transpose (contract is NCHW).
    return y_norm.reshape(n, oc_pad, oh, w_dim)[:, :oc, :, :ow]


# --------------------------------------------------------------------------
# Pure-JAX reference (bf16 matmul inputs like the MXU path, f32 BN math).
# --------------------------------------------------------------------------
def _reference(x, weight, bias, gamma, beta):
    y = lax.conv_general_dilated(
        x.astype(jnp.bfloat16), weight.astype(jnp.bfloat16),
        window_strides=(1, 1), padding="VALID",
        dimension_numbers=("NCHW", "OIHW", "NCHW"),
        preferred_element_type=jnp.float32)
    y = y + bias.reshape(1, -1, 1, 1)
    mean = jnp.mean(y, axis=(0, 2, 3), keepdims=True)
    var = jnp.mean((y - mean) ** 2, axis=(0, 2, 3), keepdims=True)
    y = (y - mean) * lax.rsqrt(var + EPS)
    y = y * gamma.reshape(1, -1, 1, 1) + beta.reshape(1, -1, 1, 1)
    return jnp.maximum(y, 0.0)


if __name__ == "__main__":
    # Small shapes consistent with the module: N=2, IC=4, H=W=16, OC=8, K=3.
    N, IC, H, W = 2, 4, 16, 16
    OC, KH, KW = 8, 3, 3

    key = jax.random.PRNGKey(0)
    kx, kw_, kb, kg, kbe = jax.random.split(key, 5)
    x = jax.random.normal(kx, (N, IC, H, W), dtype=jnp.float32)
    fan_in = IC * KH * KW
    weight = jax.random.uniform(kw_, (OC, IC, KH, KW), jnp.float32,
                                minval=-1.0, maxval=1.0) / jnp.sqrt(fan_in)
    bias = jax.random.uniform(kb, (OC,), jnp.float32, minval=-0.1, maxval=0.1)
    gamma = 1.0 + 0.1 * jax.random.normal(kg, (OC,), jnp.float32)
    beta = 0.1 * jax.random.normal(kbe, (OC,), jnp.float32)

    out = jax.jit(conv2d_block)(x, weight, bias, gamma, beta)
    out = jax.block_until_ready(out)

    ref = _reference(x, weight, bias, gamma, beta)
    assert out.shape == (N, OC, H - KH + 1, W - KW + 1), out.shape
    # Tolerance covers the bf16 conv intermediate: ~2^-9 relative storage error
    # of y, amplified by ~1/std in the batch-norm normalization.
    err = float(jnp.max(jnp.abs(out - ref)))
    assert err < 2e-2, err

    print("KERNEL_OK")
</pallas_src>

<mosaic_0001>
module attributes {stable_mosaic.version = 11 : i64} {
  func.func @_conv_stats_kernel(%arg0: i32, %arg1: memref<1x4x258xf32, #tpu.memory_space<vmem>>, %arg2: memref<128x36xbf16, #tpu.memory_space<vmem>>, %arg3: memref<1x224xf32, #tpu.memory_space<vmem>>, %arg4: memref<1x128x224xbf16, #tpu.memory_space<vmem>>, %arg5: memref<1x128x1xf32, #tpu.memory_space<vmem>>, %arg6: memref<1x128x1xf32, #tpu.memory_space<vmem>>, %arg7: memref<36x224xf32, #tpu.memory_space<vmem>>) attributes {dimension_semantics = [#tpu.dimension_semantics<parallel>], iteration_bounds = array<i64: 2>, scalar_prefetch = 0 : i64, scratch_operands = 1 : i64, tpu.core_type = #tpu.core_type<tc>, window_params = [{transform_indices = @transform_0, window_bounds = array<i64: 1, 4, 258>}, {pipeline_mode = #tpu.pipeline_mode<synchronous>, transform_indices = @transform_1, window_bounds = array<i64: 128, 36>}, {pipeline_mode = #tpu.pipeline_mode<synchronous>, transform_indices = @transform_2, window_bounds = array<i64: 1, 224>}, {transform_indices = @transform_3, window_bounds = array<i64: 1, 128, 224>}, {transform_indices = @transform_4, window_bounds = array<i64: 1, 128, 1>}, {transform_indices = @transform_5, window_bounds = array<i64: 1, 128, 1>}]} {
    %c0 = arith.constant 0 : index
    %c0_0 = arith.constant 0 : index
    %c0_1 = arith.constant 0 : index
    %0 = vector.load %arg1[%c0, %c0_0, %c0_1] : memref<1x4x258xf32, #tpu.memory_space<vmem>>, vector<1x4x224xf32>
    %1 = vector.shape_cast %0 : vector<1x4x224xf32> to vector<4x224xf32>
    %c0_2 = arith.constant 0 : index
    %c0_3 = arith.constant 0 : index
    %2 = vector.load %arg7[%c0_2, %c0_3] : memref<36x224xf32, #tpu.memory_space<vmem>>, vector<4x224xf32>
    tpu.vector_store %arg7[%c0_2, %c0_3], %1 {strides = array<i32>} : memref<36x224xf32, #tpu.memory_space<vmem>>, vector<4x224xf32>,
    %c0_4 = arith.constant 0 : index
    %c0_5 = arith.constant 0 : index
    %c1 = arith.constant 1 : index
    %3 = vector.load %arg1[%c0_4, %c0_5, %c1] : memref<1x4x258xf32, #tpu.memory_space<vmem>>, vector<1x4x224xf32>
    %4 = vector.shape_cast %3 : vector<1x4x224xf32> to vector<4x224xf32>
    %c4 = arith.constant 4 : index
    %c0_6 = arith.constant 0 : index
    %5 = vector.load %arg7[%c4, %c0_6] : memref<36x224xf32, #tpu.memory_space<vmem>>, vector<4x224xf32>
    tpu.vector_store %arg7[%c4, %c0_6], %4 {strides = array<i32>} : memref<36x224xf32, #tpu.memory_space<vmem>>, vector<4x224xf32>,
    %c0_7 = arith.constant 0 : index
    %c0_8 = arith.constant 0 : index
    %c2 = arith.constant 2 : index
    %6 = vector.load %arg1[%c0_7, %c0_8, %c2] : memref<1x4x258xf32, #tpu.memory_space<vmem>>, vector<1x4x224xf32>
    %7 = vector.shape_cast %6 : vector<1x4x224xf32> to vector<4x224xf32>
    %c8 = arith.constant 8 : index
    %c0_9 = arith.constant 0 : index
    %8 = vector.load %arg7[%c8, %c0_9] : memref<36x224xf32, #tpu.memory_space<vmem>>, vector<4x224xf32>
    tpu.vector_store %arg7[%c8, %c0_9], %7 {strides = array<i32>} : memref<36x224xf32, #tpu.memory_space<vmem>>, vector<4x224xf32>,
    %c0_10 = arith.constant 0 : index
    %c0_11 = arith.constant 0 : index
    %c16 = arith.constant 16 : index
    %9 = vector.load %arg1[%c0_10, %c0_11, %c16] : memref<1x4x258xf32, #tpu.memory_space<vmem>>, vector<1x4x224xf32>
    %10 = vector.shape_cast %9 : vector<1x4x224xf32> to vector<4x224xf32>
    %c12 = arith.constant 12 : index
    %c0_12 = arith.constant 0 : index
    %11 = vector.load %arg7[%c12, %c0_12] : memref<36x224xf32, #tpu.memory_space<vmem>>, vector<4x224xf32>
    tpu.vector_store %arg7[%c12, %c0_12], %10 {strides = array<i32>} : memref<36x224xf32, #tpu.memory_space<vmem>>, vector<4x224xf32>,
    %c0_13 = arith.constant 0 : index
    %c0_14 = arith.constant 0 : index
    %c17 = arith.constant 17 : index
    %12 = vector.load %arg1[%c0_13, %c0_14, %c17] : memref<1x4x258xf32, #tpu.memory_space<vmem>>, vector<1x4x224xf32>
    %13 = vector.shape_cast %12 : vector<1x4x224xf32> to vector<4x224xf32>
    %c16_15 = arith.constant 16 : index
    %c0_16 = arith.constant 0 : index
    %14 = vector.load %arg7[%c16_15, %c0_16] : memref<36x224xf32, #tpu.memory_space<vmem>>, vector<4x224xf32>
    tpu.vector_store %arg7[%c16_15, %c0_16], %13 {strides = array<i32>} : memref<36x224xf32, #tpu.memory_space<vmem>>, vector<4x224xf32>,
    %c0_17 = arith.constant 0 : index
    %c0_18 = arith.constant 0 : index
    %c18 = arith.constant 18 : index
    %15 = vector.load %arg1[%c0_17, %c0_18, %c18] : memref<1x4x258xf32, #tpu.memory_space<vmem>>, vector<1x4x224xf32>
    %16 = vector.shape_cast %15 : vector<1x4x224xf32> to vector<4x224xf32>
    %c20 = arith.constant 20 : index
    %c0_19 = arith.constant 0 : index
    %17 = vector.load %arg7[%c20, %c0_19] : memref<36x224xf32, #tpu.memory_space<vmem>>, vector<4x224xf32>
    tpu.vector_store %arg7[%c20, %c0_19], %16 {strides = array<i32>} : memref<36x224xf32, #tpu.memory_space<vmem>>, vector<4x224xf32>,
    %c0_20 = arith.constant 0 : index
    %c0_21 = arith.constant 0 : index
    %c32 = arith.constant 32 : index
    %18 = vector.load %arg1[%c0_20, %c0_21, %c32] : memref<1x4x258xf32, #tpu.memory_space<vmem>>, vector<1x4x224xf32>
    %19 = vector.shape_cast %18 : vector<1x4x224xf32> to vector<4x224xf32>
    %c24 = arith.constant 24 : index
    %c0_22 = arith.constant 0 : index
    %20 = vector.load %arg7[%c24, %c0_22] : memref<36x224xf32, #tpu.memory_space<vmem>>, vector<4x224xf32>
    tpu.vector_store %arg7[%c24, %c0_22], %19 {strides = array<i32>} : memref<36x224xf32, #tpu.memory_space<vmem>>, vector<4x224xf32>,
    %c0_23 = arith.constant 0 : index
    %c0_24 = arith.constant 0 : index
    %c33 = arith.constant 33 : index
    %21 = vector.load %arg1[%c0_23, %c0_24, %c33] : memref<1x4x258xf32, #tpu.memory_space<vmem>>, vector<1x4x224xf32>
    %22 = vector.shape_cast %21 : vector<1x4x224xf32> to vector<4x224xf32>
    %c28 = arith.constant 28 : index
    %c0_25 = arith.constant 0 : index
    %23 = vector.load %arg7[%c28, %c0_25] : memref<36x224xf32, #tpu.memory_space<vmem>>, vector<4x224xf32>
    tpu.vector_store %arg7[%c28, %c0_25], %22 {strides = array<i32>} : memref<36x224xf32, #tpu.memory_space<vmem>>, vector<4x224xf32>,
    %c0_26 = arith.constant 0 : index
    %c0_27 = arith.constant 0 : index
    %c34 = arith.constant 34 : index
    %24 = vector.load %arg1[%c0_26, %c0_27, %c34] : memref<1x4x258xf32, #tpu.memory_space<vmem>>, vector<1x4x224xf32>
    %25 = vector.shape_cast %24 : vector<1x4x224xf32> to vector<4x224xf32>
    %c32_28 = arith.constant 32 : index
    %c0_29 = arith.constant 0 : index
    %26 = vector.load %arg7[%c32_28, %c0_29] : memref<36x224xf32, #tpu.memory_space<vmem>>, vector<4x224xf32>
    tpu.vector_store %arg7[%c32_28, %c0_29], %25 {strides = array<i32>} : memref<36x224xf32, #tpu.memory_space<vmem>>, vector<4x224xf32>,
    %c0_30 = arith.constant 0 : index
    %c0_31 = arith.constant 0 : index
    %27 = vector.load %arg7[%c0_30, %c0_31] : memref<36x224xf32, #tpu.memory_space<vmem>>, vector<36x224xf32>
    %28 = arith.truncf %27 : vector<36x224xf32> to vector<36x224xbf16>
    %c0_32 = arith.constant 0 : index
    %c0_33 = arith.constant 0 : index
    %29 = vector.load %arg2[%c0_32, %c0_33] : memref<128x36xbf16, #tpu.memory_space<vmem>>, vector<128x36xbf16>
    %cst = arith.constant dense<0.000000e+00> : vector<128x224xf32>
    %30 = tpu.matmul %29, %28, %cst {dimension_numbers = #tpu.dot_dimension_numbers<[1], [0], [0], [1], [0, 0, 1, 1], [], []>} : vector<128x36xbf16>, vector<36x224xbf16>, vector<128x224xf32> -> vector<128x224xf32>
    %31 = arith.truncf %30 : vector<128x224xf32> to vector<128x224xbf16>
    %c0_34 = arith.constant 0 : index
    %c0_35 = arith.constant 0 : index
    %c0_36 = arith.constant 0 : index
    %32 = vector.load %arg4[%c0_34, %c0_35, %c0_36] : memref<1x128x224xbf16, #tpu.memory_space<vmem>>, vector<1x128x224xbf16>
    %33 = vector.shape_cast %32 : vector<1x128x224xbf16> to vector<128x224xbf16>
    %34 = vector.shape_cast %31 : vector<128x224xbf16> to vector<1x128x224xbf16>
    tpu.vector_store %arg4[%c0_34, %c0_35, %c0_36], %34 {strides = array<i32>} : memref<1x128x224xbf16, #tpu.memory_space<vmem>>, vector<1x128x224xbf16>,
    %c0_37 = arith.constant 0 : index
    %c0_38 = arith.constant 0 : index
    %35 = vector.load %arg3[%c0_37, %c0_38] : memref<1x224xf32, #tpu.memory_space<vmem>>, vector<1x224xf32>
    %36 = vector.broadcast %35 : vector<1x224xf32> to vector<128x224xf32>
    %37 = arith.mulf %30, %36 : vector<128x224xf32>
    %cst_39 = arith.constant dense<0.000000e+00> : vector<128xf32>
    %38 = vector.multi_reduction <add>, %37, %cst_39 [1] : vector<128x224xf32> to vector<128xf32>
    %39 = vector.shape_cast %38 : vector<128xf32> to vector<128x1xf32>
    %c0_40 = arith.constant 0 : index
    %c0_41 = arith.constant 0 : index
    %c0_42 = arith.constant 0 : index
    %40 = vector.load %arg5[%c0_40, %c0_41, %c0_42] : memref<1x128x1xf32, #tpu.memory_space<vmem>>, vector<1x128x1xf32>
    %41 = vector.shape_cast %40 : vector<1x128x1xf32> to vector<128x1xf32>
    %42 = vector.shape_cast %39 : vector<128x1xf32> to vector<1x128x1xf32>
    tpu.vector_store %arg5[%c0_40, %c0_41, %c0_42], %42 {strides = array<i32>} : memref<1x128x1xf32, #tpu.memory_space<vmem>>, vector<1x128x1xf32>,
    %43 = arith.mulf %37, %37 : vector<128x224xf32>
    %cst_43 = arith.constant dense<0.000000e+00> : vector<128xf32>
    %44 = vector.multi_reduction <add>, %43, %cst_43 [1] : vector<128x224xf32> to vector<128xf32>
    %45 = vector.shape_cast %44 : vector<128xf32> to vector<128x1xf32>
    %c0_44 = arith.constant 0 : index
    %c0_45 = arith.constant 0 : index
    %c0_46 = arith.constant 0 : index
    %46 = vector.load %arg6[%c0_44, %c0_45, %c0_46] : memref<1x128x1xf32, #tpu.memory_space<vmem>>, vector<1x128x1xf32>
    %47 = vector.shape_cast %46 : vector<1x128x1xf32> to vector<128x1xf32>
    %48 = vector.shape_cast %45 : vector<128x1xf32> to vector<1x128x1xf32>
    tpu.vector_store %arg6[%c0_44, %c0_45, %c0_46], %48 {strides = array<i32>} : memref<1x128x1xf32, #tpu.memory_space<vmem>>, vector<1x128x1xf32>,
    return
  }
  func.func @transform_0(%arg0: i32) -> (i32, i32, i32) {
    %c0_i32 = arith.constant 0 : i32
    %c0_i32_0 = arith.constant 0 : i32
    %c0_i32_1 = arith.constant 0 : i32
    return %arg0, %c0_i32, %c0_i32_0 : i32, i32, i32
  }
  func.func @transform_1(%arg0: i32) -> (i32, i32) {
    %c0_i32 = arith.constant 0 : i32
    %c0_i32_0 = arith.constant 0 : i32
    %c0_i32_1 = arith.constant 0 : i32
    return %c0_i32, %c0_i32_0 : i32, i32
  }
  func.func @transform_2(%arg0: i32) -> (i32, i32) {
    %c0_i32 = arith.constant 0 : i32
    %c0_i32_0 = arith.constant 0 : i32
    %c0_i32_1 = arith.constant 0 : i32
    return %c0_i32, %c0_i32_0 : i32, i32
  }
  func.func @transform_3(%arg0: i32) -> (i32, i32, i32) {
    %c0_i32 = arith.constant 0 : i32
    %c0_i32_0 = arith.constant 0 : i32
    %c0_i32_1 = arith.constant 0 : i32
    return %arg0, %c0_i32, %c0_i32_0 : i32, i32, i32
  }
  func.func @transform_4(%arg0: i32) -> (i32, i32, i32) {
    %c0_i32 = arith.constant 0 : i32
    %c0_i32_0 = arith.constant 0 : i32
    %c0_i32_1 = arith.constant 0 : i32
    return %arg0, %c0_i32, %c0_i32_0 : i32, i32, i32
  }
  func.func @transform_5(%arg0: i32) -> (i32, i32, i32) {
    %c0_i32 = arith.constant 0 : i32
    %c0_i32_0 = arith.constant 0 : i32
    %c0_i32_1 = arith.constant 0 : i32
    return %arg0, %c0_i32, %c0_i32_0 : i32, i32, i32
  }
}

module attributes {stable_mosaic.version = 11 : i64} {
  func.func @_bn_relu_kernel(%arg0: i32, %arg1: i32, %arg2: memref<1x128x224xbf16, #tpu.memory_space<vmem>>, %arg3: memref<1x128x1xf32, #tpu.memory_space<vmem>>, %arg4: memref<1x128x1xf32, #tpu.memory_space<vmem>>, %arg5: memref<1x128x224xf32, #tpu.memory_space<vmem>>) attributes {dimension_semantics = [#tpu.dimension_semantics<parallel>, #tpu.dimension_semantics<parallel>], iteration_bounds = array<i64: 2, 1>, scalar_prefetch = 0 : i64, scratch_operands = 0 : i64, tpu.core_type = #tpu.core_type<tc>, window_params = [{transform_indices = @transform_0, window_bounds = array<i64: 1, 128, 224>}, {pipeline_mode = #tpu.pipeline_mode<synchronous>, transform_indices = @transform_1, window_bounds = array<i64: 1, 128, 1>}, {pipeline_mode = #tpu.pipeline_mode<synchronous>, transform_indices = @transform_2, window_bounds = array<i64: 1, 128, 1>}, {transform_indices = @transform_3, window_bounds = array<i64: 1, 128, 224>}]} {
    %c0 = arith.constant 0 : index
    %c0_0 = arith.constant 0 : index
    %c0_1 = arith.constant 0 : index
    %0 = vector.load %arg2[%c0, %c0_0, %c0_1] : memref<1x128x224xbf16, #tpu.memory_space<vmem>>, vector<1x128x224xbf16>
    %1 = vector.shape_cast %0 : vector<1x128x224xbf16> to vector<128x224xbf16>
    %2 = arith.extf %1 : vector<128x224xbf16> to vector<128x224xf32>
    %c0_2 = arith.constant 0 : index
    %c0_3 = arith.constant 0 : index
    %c0_4 = arith.constant 0 : index
    %3 = vector.load %arg3[%c0_2, %c0_3, %c0_4] : memref<1x128x1xf32, #tpu.memory_space<vmem>>, vector<1x128x1xf32>
    %4 = vector.shape_cast %3 : vector<1x128x1xf32> to vector<128x1xf32>
    %5 = vector.broadcast %4 : vector<128x1xf32> to vector<128x224xf32>
    %6 = arith.mulf %2, %5 : vector<128x224xf32>
    %c0_5 = arith.constant 0 : index
    %c0_6 = arith.constant 0 : index
    %c0_7 = arith.constant 0 : index
    %7 = vector.load %arg4[%c0_5, %c0_6, %c0_7] : memref<1x128x1xf32, #tpu.memory_space<vmem>>, vector<1x128x1xf32>
    %8 = vector.shape_cast %7 : vector<1x128x1xf32> to vector<128x1xf32>
    %9 = vector.broadcast %8 : vector<128x1xf32> to vector<128x224xf32>
    %10 = arith.addf %6, %9 : vector<128x224xf32>
    %cst = arith.constant 0.000000e+00 : f32
    %11 = vector.broadcast %cst : f32 to vector<128x224xf32>
    %12 = arith.maximumf %10, %11 : vector<128x224xf32>
    %c0_8 = arith.constant 0 : index
    %c0_9 = arith.constant 0 : index
    %c0_10 = arith.constant 0 : index
    %13 = vector.load %arg5[%c0_8, %c0_9, %c0_10] : memref<1x128x224xf32, #tpu.memory_space<vmem>>, vector<1x128x224xf32>
    %14 = vector.shape_cast %13 : vector<1x128x224xf32> to vector<128x224xf32>
    %15 = vector.shape_cast %12 : vector<128x224xf32> to vector<1x128x224xf32>
    tpu.vector_store %arg5[%c0_8, %c0_9, %c0_10], %15 {strides = array<i32>} : memref<1x128x224xf32, #tpu.memory_space<vmem>>, vector<1x128x224xf32>,
    return
  }
  func.func @transform_0(%arg0: i32, %arg1: i32) -> (i32, i32, i32) {
    %c0_i32 = arith.constant 0 : i32
    %c0_i32_0 = arith.constant 0 : i32
    return %arg0, %c0_i32, %arg1 : i32, i32, i32
  }
  func.func @transform_1(%arg0: i32, %arg1: i32) -> (i32, i32, i32) {
    %c0_i32 = arith.constant 0 : i32
    %c0_i32_0 = arith.constant 0 : i32
    %c0_i32_1 = arith.constant 0 : i32
    %c0_i32_2 = arith.constant 0 : i32
    return %c0_i32, %c0_i32_0, %c0_i32_1 : i32, i32, i32
  }
  func.func @transform_2(%arg0: i32, %arg1: i32) -> (i32, i32, i32) {
    %c0_i32 = arith.constant 0 : i32
    %c0_i32_0 = arith.constant 0 : i32
    %c0_i32_1 = arith.constant 0 : i32
    %c0_i32_2 = arith.constant 0 : i32
    return %c0_i32, %c0_i32_0, %c0_i32_1 : i32, i32, i32
  }
  func.func @transform_3(%arg0: i32, %arg1: i32) -> (i32, i32, i32) {
    %c0_i32 = arith.constant 0 : i32
    %c0_i32_0 = arith.constant 0 : i32
    return %arg0, %c0_i32, %arg1 : i32, i32, i32
  }
}

</mosaic_0001>

<bundles_post_ra>
// kernel: conv2d_block.3
= control target key start
LH: loop header
LB: loop body
LE: loop exit
PB: predicated region body
PF: predicated region fallthrough
CT: control target
= control target key end

     0   :  { %s751_s12 = smov 0   ;;  %s753_s13 = smov 0   ;;  %s1004_s0 = inlined_call_operand.vmem [shape: bf16[2,128,224], index: 0, kind: input, shape index: {}]   ;;  %s1005_s1 = inlined_call_operand.vmem [shape: f32[1,128,1], index: 1, kind: input, shape index: {}]   ;;  %s1006_s2 = inlined_call_operand.vmem [shape: f32[1,128,1], index: 2, kind: input, shape index: {}]   ;;  %s1007_s3 = inlined_call_operand.vmem [shape: f32[2,128,224], index: 3, kind: output, shape index: {}]  }
   0x1   :  { %s755_s14 = smov 0  }
   0x2 LB: > { %s25_s15 = sadd.s32 1, %s724_s13  ;;  %p670_p0 = scmp.ge.s32.totalorder %s728_s14, 1  ;;  %s728_s14 = sphi %s755_s14, %s13_s14   ;;  %s724_s13 = sphi %s753_s13, %s1009_s13   ;;  %s720_s12 = sphi %s751_s12, %s1008_s12  }
   0x3   : > { %p27_p1 = scmp.ge.s32.totalorder %s25_s15, 2  ;;  %p158_p2 = scmp.lt.s32.totalorder %s728_s14, 3 }
   0x5   : > { %s1011_s15 = smov (%p27_p1, %s25_s15), 0  ;;  %p159_p3 = pnand %p670_p0, %p158_p2 }
   0x6   : > { %v260_v0 = vld [vmem:[%s1005_s1 + $0x10] sm:$0xff] (!%p159_p3)  ;;  %v258_v1 = vld [vmem:[%s1005_s1] sm:$0xff] (!%p159_p3)  ;;  %v730_v2 = vmov (!%p159_p3), 0   ;;  %v261_v3 = vld [vmem:[%s1005_s1 + $0x18] sm:$0xff] (!%p159_p3)  ;;  %p191_p4 = scmp.lt.s32.totalorder (!%p159_p3), %s720_s12, 1  ;;  %vm547_vm0 = vcmask (!%p159_p3), 785408  }
   0x7   : > { %162 = sbr.rel (%p159_p3) target bundleno = 202 (0xca), region = 32  ;;  %705 = vset.pattern.permute.xlu1 (!%p159_p3), %v730_v2  ;;  %704 = vset.pattern.permute.xlu0 (!%p159_p3), %v730_v2  ;;  %v259_v4 = vld [vmem:[%s1005_s1 + $0x8] sm:$0xff] (!%p159_p3)  ;;  %v262_v6 = vld [vmem:[%s1005_s1 + $0x20] sm:$0xff] (!%p159_p3)  ;;  %v265_v7 = vld [vmem:[%s1005_s1 + $0x38] sm:$0xff] (!%p159_p3) }
   0x8   : > { %286 = vperm.xlu1 (!%p159_p3), %705, %v260_v0   ;;  %276 = vperm.xlu0 (!%p159_p3), %704, %v258_v1   ;;  %v263_v5 = vld [vmem:[%s1005_s1 + $0x28] sm:$0xff] (!%p159_p3)  ;;  %v264_v8 = vld [vmem:[%s1005_s1 + $0x30] sm:$0xff] (!%p159_p3)  ;;  %v266_v10 = vld [vmem:[%s1005_s1 + $0x40] sm:$0xff] (!%p159_p3) }
   0x9   : > { %v267_v9 = vld [vmem:[%s1005_s1 + $0x48] sm:$0xff] (!%p159_p3)  ;;  %v269_v11 = vld [vmem:[%s1005_s1 + $0x58] sm:$0xff] (!%p159_p3)  ;;  %v268_v12 = vld [vmem:[%s1005_s1 + $0x50] sm:$0xff] (!%p159_p3) }
   0xa   : > { %v271_v13 = vld [vmem:[%s1005_s1 + $0x68] sm:$0xff] (!%p159_p3)  ;;  %v270_v14 = vld [vmem:[%s1005_s1 + $0x60] sm:$0xff] (!%p159_p3)  ;;  %v273_v15 = vld [vmem:[%s1005_s1 + $0x78] sm:$0xff] (!%p159_p3) }
   0xb   : > { %v272_v16 = vld [vmem:[%s1005_s1 + $0x70] sm:$0xff] (!%p159_p3)  ;;  %v387_v17 = vld [vmem:[%s1006_s2 + $0x8] sm:$0xff] (!%p159_p3)  ;;  %v386_v18 = vld [vmem:[%s1006_s2] sm:$0xff] (!%p159_p3) }
   0xc   : > { %291 = vperm.xlu1 (!%p159_p3), %705, %v261_v3   ;;  %281 = vperm.xlu0 (!%p159_p3), %704, %v259_v4   ;;  %v389_v19 = vld [vmem:[%s1006_s2 + $0x18] sm:$0xff] (!%p159_p3)  ;;  %v388_v20 = vld [vmem:[%s1006_s2 + $0x10] sm:$0xff] (!%p159_p3)  ;;  %v391_v21 = vld [vmem:[%s1006_s2 + $0x28] sm:$0xff] (!%p159_p3) }
   0xd   : > { %v390_v22 = vld [vmem:[%s1006_s2 + $0x20] sm:$0xff] (!%p159_p3)  ;;  %v393_v23 = vld [vmem:[%s1006_s2 + $0x38] sm:$0xff] (!%p159_p3)  ;;  %v392_v24 = vld [vmem:[%s1006_s2 + $0x30] sm:$0xff] (!%p159_p3) }
   0xe   : > { %v395_v25 = vld [vmem:[%s1006_s2 + $0x48] sm:$0xff]  ;;  %v394_v26 = vld [vmem:[%s1006_s2 + $0x40] sm:$0xff]  ;;  %v397_v27 = vld [vmem:[%s1006_s2 + $0x58] sm:$0xff]  ;;  %s1013_s12 = smov (!%p191_p4, %s720_s12), 1 }
   0xf   : > { %v396_v28 = vld [vmem:[%s1006_s2 + $0x50] sm:$0xff]  ;;  %v399_v29 = vld [vmem:[%s1006_s2 + $0x68] sm:$0xff]  ;;  %v398_v30 = vld [vmem:[%s1006_s2 + $0x60] sm:$0xff]  ;;  %s677_s7 = sshll.u32 %s1013_s12, 7  ;;  %s678_s11 = sshll.u32 %s1013_s12, 8 }
  0x10   : > { %301 = vperm.xlu1 %705, %v263_v5   ;;  %296 = vperm.xlu0 %704, %v262_v6   ;;  %v401_v31 = vld [vmem:[%s1006_s2 + $0x78] sm:$0xff]  ;;  %v400_v32 = vld [vmem:[%s1006_s2 + $0x70] sm:$0xff]  ;;  %s891_s10 = scalar_lea.vmem %s1004_s0, %s677_s7  ;;  %s913_s12 = scalar_lea.vmem %s1007_s3, %s678_s11 }
  0x11   : > { %v210_v45 = vld [vmem:[%s891_s10] sm:$0xff]  ;;  %v211_v46 = vld [vmem:[%s891_s10 + $0x8] sm:$0xff]  ;;  %v212_v49 = vld [vmem:[%s891_s10 + $0x10] sm:$0xff] }
  0x12   : > { %v226_v50 = vunpack.c.l.bf16 %v210_v45  ;;  %v227_v51 = vunpack.c.h.bf16 %v210_v45  ;;  %v213_v52 = vld [vmem:[%s891_s10 + $0x18] sm:$0xff]  ;;  %v228_v53 = vunpack.c.l.bf16 %v211_v46  ;;  %v229_v54 = vunpack.c.h.bf16 %v211_v46  ;;  %v215_v55 = vld [vmem:[%s891_s10 + $0x28] sm:$0xff]  ;;  %v214_v59 = vld [vmem:[%s891_s10 + $0x20] sm:$0xff] }
  0x13   : > { %v230_v58 = vunpack.c.l.bf16 %v212_v49  ;;  %v231_v60 = vunpack.c.h.bf16 %v212_v49  ;;  %v232_v61 = vunpack.c.l.bf16 %v213_v52  ;;  %v233_v62 = vunpack.c.h.bf16 %v213_v52 }
  0x14   : > { %311 = vperm.xlu1 %705, %v265_v7   ;;  %306 = vperm.xlu0 %704, %v264_v8   ;;  %v236_v63 = vunpack.c.l.bf16 %v215_v55  ;;  %v237_v4 = vunpack.c.h.bf16 %v215_v55  ;;  %v234_v5 = vunpack.c.l.bf16 %v214_v59  ;;  %v235_v6 = vunpack.c.h.bf16 %v214_v59 }
  0x18   : > { %321 = vperm.xlu1 %705, %v267_v9   ;;  %316 = vperm.xlu0 %704, %v266_v10   ;;  %v217_v9 = vld [vmem:[%s891_s10 + $0x38] sm:$0xff]  ;;  %v216_v10 = vld [vmem:[%s891_s10 + $0x30] sm:$0xff] }
  0x1c   : > { %331 = vperm.xlu1 %705, %v269_v11   ;;  %326 = vperm.xlu0 %704, %v268_v12  }
  0x20   : > { %341 = vperm.xlu1 %705, %v271_v13   ;;  %336 = vperm.xlu0 %704, %v270_v14  }
  0x24   : > { %351 = vperm.xlu1 %705, %v273_v15   ;;  %346 = vperm.xlu0 %704, %v272_v16  }
  0x28   : > { %409 = vperm.xlu1 %705, %v387_v17   ;;  %404 = vperm.xlu0 %704, %v386_v18  }
  0x2c   : > { %419 = vperm.xlu1 %705, %v389_v19   ;;  %414 = vperm.xlu0 %704, %v388_v20  }
  0x30   : > { %429 = vperm.xlu1 %705, %v391_v21   ;;  %424 = vperm.xlu0 %704, %v390_v22  }
  0x34   : > { %439 = vperm.xlu1 %705, %v393_v23   ;;  %434 = vperm.xlu0 %704, %v392_v24   ;;  %v240_v23 = vunpack.c.l.bf16 %v217_v9  ;;  %v241_v24 = vunpack.c.h.bf16 %v217_v9 }
  0x38   : > { %449 = vperm.xlu1 %705, %v395_v25   ;;  %444 = vperm.xlu0 %704, %v394_v26   ;;  %v238_v25 = vunpack.c.l.bf16 %v216_v10  ;;  %v239_v26 = vunpack.c.h.bf16 %v216_v10 }
  0x3c   : > { %459 = vperm.xlu1 %705, %v397_v27   ;;  %454 = vperm.xlu0 %704, %v396_v28  }
  0x40   : > { %469 = vperm.xlu1 %705, %v399_v29   ;;  %464 = vperm.xlu0 %704, %v398_v30   ;;  %v219_v29 = vld [vmem:[%s891_s10 + $0x48] sm:$0xff]  ;;  %v218_v30 = vld [vmem:[%s891_s10 + $0x40] sm:$0xff] }
  0x41   : > { %v242_v55 = vunpack.c.l.bf16 %v218_v30 }
  0x44   : > { %479 = vperm.xlu1 %705, %v401_v31   ;;  %474 = vperm.xlu0 %704, %v400_v32  }
  0x87   : > { %v287_v33 = vpop.permute.xlu1 %286  ;;  %v277_v34 = vpop.permute.xlu0 %276 }
  0x88   : > { %v354_v0 = vmul.f32 %v277_v34, %v226_v50  ;;  %v355_v1 = vmul.f32 %v277_v34, %v227_v51  ;;  %v358_v15 = vmul.f32 %v287_v33, %v230_v58  ;;  %v359_v16 = vmul.f32 %v287_v33, %v231_v60 }
  0x89   : > { %v243_v58 = vunpack.c.h.bf16 %v218_v30 }
  0x8b   : > { %v292_v35 = vpop.permute.xlu1 %291  ;;  %v282_v36 = vpop.permute.xlu0 %281 }
  0x8c   : > { %v356_v2 = vmul.f32 %v282_v36, %v228_v53  ;;  %v357_v3 = vmul.f32 %v282_v36, %v229_v54  ;;  %v360_v17 = vmul.f32 %v292_v35, %v232_v61  ;;  %v361_v18 = vmul.f32 %v292_v35, %v233_v62  ;;  %v221_v61 = vld [vmem:[%s891_s10 + $0x58] sm:$0xff]  ;;  %v220_v62 = vld [vmem:[%s891_s10 + $0x50] sm:$0xff] }
  0x8d   : > { %v244_v53 = vunpack.c.l.bf16 %v219_v29  ;;  %v245_v54 = vunpack.c.h.bf16 %v219_v29  ;;  %v248_v9 = vunpack.c.l.bf16 %v221_v61  ;;  %v249_v10 = vunpack.c.h.bf16 %v221_v61 }
  0x8f   : > { %v867_v37 = vpop.permute.xlu1 %301  ;;  %v869_v38 = vpop.permute.xlu0 %296 }
  0x90   : > { %v364_v35 = vmul.f32 %v867_v37, %v236_v63  ;;  %v365_v36 = vmul.f32 %v867_v37, %v237_v4  ;;  %v362_v45 = vmul.f32 %v869_v38, %v234_v5  ;;  %v363_v46 = vmul.f32 %v869_v38, %v235_v6 }
  0x93   : > { %v872_v39 = vpop.permute.xlu1 %311  ;;  %v874_v40 = vpop.permute.xlu0 %306 }
  0x94   : > { %v367_v4 = vmul.f32 %v874_v40, %v239_v26 }
  0x97   : > { %v879_v41 = vpop.permute.xlu1 %321  ;;  %v881_v42 = vpop.permute.xlu0 %316 }
  0x9b   : > { %v884_v43 = vpop.permute.xlu1 %331  ;;  %v886_v44 = vpop.permute.xlu0 %326 }
  0x9f   : > { %v895_v47 = vpop.permute.xlu1 %341  ;;  %v897_v48 = vpop.permute.xlu0 %336 }
  0xa3   : > { %v902_v56 = vpop.permute.xlu1 %351  ;;  %v904_v57 = vpop.permute.xlu0 %346 }
  0xa7   : > { %v410_v7 = vpop.permute.xlu1 %409  ;;  %v405_v8 = vpop.permute.xlu0 %404 }
  0xa8   : > { %v484_v11 = vadd.f32 %v410_v7, %v356_v2  ;;  %v485_v12 = vadd.f32 %v410_v7, %v357_v3  ;;  %v482_v13 = vadd.f32 %v405_v8, %v354_v0  ;;  %v483_v14 = vadd.f32 %v405_v8, %v355_v1 }
  0xa9   : > { %v368_v1 = vmul.f32 %v872_v39, %v240_v23  ;;  %v369_v2 = vmul.f32 %v872_v39, %v241_v24  ;;  %v366_v3 = vmul.f32 %v874_v40, %v238_v25 }
  0xaa   : > { %v516_v19 = vmax.f32 %v484_v11, 0.0  ;;  %v517_v20 = vmax.f32 %v485_v12, 0.0  ;;  %v514_v21 = vmax.f32 %v482_v13, 0.0  ;;  %v515_v22 = vmax.f32 %v483_v14, 0.0 }
  0xab   : > { %v420_v27 = vpop.permute.xlu1 %419  ;;  %v415_v28 = vpop.permute.xlu0 %414  ;;  %v246_v11 = vunpack.c.l.bf16 %v220_v62  ;;  %v247_v12 = vunpack.c.h.bf16 %v220_v62 }
  0xac   : > { %549 = vst [vmem:[%s913_s12 + $0x10] sm:$0xff] %v516_v19  ;;  %550 = vst.msk [vmem:[%s913_s12 + $0x18] sm:$0xff] %vm547_vm0, %v517_v20  ;;  %v488_v31 = vadd.f32 %v420_v27, %v360_v17  ;;  %v489_v32 = vadd.f32 %v420_v27, %v361_v18  ;;  %v486_v33 = vadd.f32 %v415_v28, %v358_v15  ;;  %v223_v15 = vld [vmem:[%s891_s10 + $0x68] sm:$0xff] }
  0xad   : > { %546 = vst [vmem:[%s913_s12] sm:$0xff] %v514_v21  ;;  %548 = vst.msk [vmem:[%s913_s12 + $0x8] sm:$0xff] %vm547_vm0, %v515_v22  ;;  %v487_v34 = vadd.f32 %v415_v28, %v359_v16  ;;  %v222_v16 = vld [vmem:[%s891_s10 + $0x60] sm:$0xff]  ;;  %v372_v19 = vmul.f32 %v879_v41, %v244_v53  ;;  %v373_v20 = vmul.f32 %v879_v41, %v245_v54  ;;  %v252_v27 = vunpack.c.l.bf16 %v223_v15 }
  0xae   : > { %v520_v49 = vmax.f32 %v488_v31, 0.0  ;;  %v521_v50 = vmax.f32 %v489_v32, 0.0  ;;  %v518_v51 = vmax.f32 %v486_v33, 0.0  ;;  %v370_v21 = vmul.f32 %v881_v42, %v242_v55  ;;  %v225_v33 = vld [vmem:[%s891_s10 + $0x78] sm:$0xff] }
  0xaf   : > { %v519_v52 = vmax.f32 %v487_v34, 0.0  ;;  %v430_v59 = vpop.permute.xlu1 %429  ;;  %v425_v60 = vpop.permute.xlu0 %424  ;;  %v371_v22 = vmul.f32 %v881_v42, %v243_v58  ;;  %v253_v28 = vunpack.c.h.bf16 %v223_v15  ;;  %v250_v29 = vunpack.c.l.bf16 %v222_v16  ;;  %v224_v34 = vld [vmem:[%s891_s10 + $0x70] sm:$0xff] }
  0xb0   : > { %553 = vst [vmem:[%s913_s12 + $0x30] sm:$0xff] %v520_v49  ;;  %554 = vst.msk [vmem:[%s913_s12 + $0x38] sm:$0xff] %vm547_vm0, %v521_v50  ;;  %v492_v37 = vadd.f32 %v430_v59, %v364_v35  ;;  %v493_v38 = vadd.f32 %v430_v59, %v365_v36  ;;  %v490_v63 = vadd.f32 %v425_v60, %v362_v45  ;;  %v251_v30 = vunpack.c.h.bf16 %v222_v16 }
  0xb1   : > { %551 = vst [vmem:[%s913_s12 + $0x20] sm:$0xff] %v518_v51  ;;  %552 = vst.msk [vmem:[%s913_s12 + $0x28] sm:$0xff] %vm547_vm0, %v519_v52  ;;  %v491_v0 = vadd.f32 %v425_v60, %v363_v46  ;;  %v376_v45 = vmul.f32 %v884_v43, %v248_v9  ;;  %v377_v46 = vmul.f32 %v884_v43, %v249_v10  ;;  %v256_v55 = vunpack.c.l.bf16 %v225_v33 }
  0xb2   : > { %v524_v5 = vmax.f32 %v492_v37, 0.0  ;;  %v525_v6 = vmax.f32 %v493_v38, 0.0  ;;  %v522_v7 = vmax.f32 %v490_v63, 0.0  ;;  %v374_v49 = vmul.f32 %v886_v44, %v246_v11 }
  0xb3   : > { %v523_v8 = vmax.f32 %v491_v0, 0.0  ;;  %v440_v13 = vpop.permute.xlu1 %439  ;;  %v435_v14 = vpop.permute.xlu0 %434  ;;  %v375_v50 = vmul.f32 %v886_v44, %v247_v12  ;;  %v257_v58 = vunpack.c.h.bf16 %v225_v33  ;;  %v254_v59 = vunpack.c.l.bf16 %v224_v34 }
  0xb4   : > { %557 = vst [vmem:[%s913_s12 + $0x50] sm:$0xff] %v524_v5  ;;  %558 = vst.msk [vmem:[%s913_s12 + $0x58] sm:$0xff] %vm547_vm0, %v525_v6  ;;  %v496_v39 = vadd.f32 %v440_v13, %v368_v1  ;;  %v497_v40 = vadd.f32 %v440_v13, %v369_v2  ;;  %v494_v17 = vadd.f32 %v435_v14, %v366_v3  ;;  %v255_v60 = vunpack.c.h.bf16 %v224_v34 }
  0xb5   : > { %555 = vst [vmem:[%s913_s12 + $0x40] sm:$0xff] %v522_v7  ;;  %556 = vst.msk [vmem:[%s913_s12 + $0x48] sm:$0xff] %vm547_vm0, %v523_v8  ;;  %v495_v18 = vadd.f32 %v435_v14, %v367_v4  ;;  %v380_v63 = vmul.f32 %v895_v47, %v252_v27  ;;  %v381_v0 = vmul.f32 %v895_v47, %v253_v28 }
  0xb6   : > { %v528_v23 = vmax.f32 %v496_v39, 0.0  ;;  %v529_v24 = vmax.f32 %v497_v40, 0.0  ;;  %v526_v25 = vmax.f32 %v494_v17, 0.0  ;;  %v378_v1 = vmul.f32 %v897_v48, %v250_v29 }
  0xb7   : > { %v527_v26 = vmax.f32 %v495_v18, 0.0  ;;  %v450_v31 = vpop.permute.xlu1 %449  ;;  %v445_v32 = vpop.permute.xlu0 %444  ;;  %v379_v2 = vmul.f32 %v897_v48, %v251_v30  ;;  %v384_v11 = vmul.f32 %v902_v56, %v256_v55  ;;  %v385_v12 = vmul.f32 %v902_v56, %v257_v58 }
  0xb8   : > { %561 = vst [vmem:[%s913_s12 + $0x70] sm:$0xff] %v528_v23  ;;  %562 = vst.msk [vmem:[%s913_s12 + $0x78] sm:$0xff] %vm547_vm0, %v529_v24  ;;  %v500_v41 = vadd.f32 %v450_v31, %v372_v19  ;;  %v501_v42 = vadd.f32 %v450_v31, %v373_v20  ;;  %v498_v35 = vadd.f32 %v445_v32, %v370_v21 }
  0xb9   : > { %559 = vst [vmem:[%s913_s12 + $0x60] sm:$0xff] %v526_v25  ;;  %560 = vst.msk [vmem:[%s913_s12 + $0x68] sm:$0xff] %vm547_vm0, %v527_v26  ;;  %v499_v36 = vadd.f32 %v445_v32, %v371_v22  ;;  %v382_v13 = vmul.f32 %v904_v57, %v254_v59  ;;  %v383_v14 = vmul.f32 %v904_v57, %v255_v60 }
  0xba   : > { %v532_v51 = vmax.f32 %v500_v41, 0.0  ;;  %v533_v52 = vmax.f32 %v501_v42, 0.0  ;;  %v530_v53 = vmax.f32 %v498_v35, 0.0 }
  0xbb   : > { %v531_v54 = vmax.f32 %v499_v36, 0.0  ;;  %v460_v61 = vpop.permute.xlu1 %459  ;;  %v455_v62 = vpop.permute.xlu0 %454 }
  0xbc   : > { %565 = vst [vmem:[%s913_s12 + $0x90] sm:$0xff] %v532_v51  ;;  %566 = vst.msk [vmem:[%s913_s12 + $0x98] sm:$0xff] %vm547_vm0, %v533_v52  ;;  %v504_v43 = vadd.f32 %v460_v61, %v376_v45  ;;  %v505_v44 = vadd.f32 %v460_v61, %v377_v46  ;;  %v502_v37 = vadd.f32 %v455_v62, %v374_v49 }
  0xbd   : > { %563 = vst [vmem:[%s913_s12 + $0x80] sm:$0xff] %v530_v53  ;;  %564 = vst.msk [vmem:[%s913_s12 + $0x88] sm:$0xff] %vm547_vm0, %v531_v54  ;;  %v503_v38 = vadd.f32 %v455_v62, %v375_v50 }
  0xbe   : > { %v536_v3 = vmax.f32 %v504_v43, 0.0  ;;  %v537_v4 = vmax.f32 %v505_v44, 0.0  ;;  %v534_v5 = vmax.f32 %v502_v37, 0.0 }
  0xbf   : > { %v535_v6 = vmax.f32 %v503_v38, 0.0  ;;  %v470_v7 = vpop.permute.xlu1 %469  ;;  %v465_v8 = vpop.permute.xlu0 %464 }
  0xc0   : > { %569 = vst [vmem:[%s913_s12 + $0xb0] sm:$0xff] %v536_v3  ;;  %570 = vst.msk [vmem:[%s913_s12 + $0xb8] sm:$0xff] %vm547_vm0, %v537_v4  ;;  %v508_v9 = vadd.f32 %v470_v7, %v380_v63  ;;  %v509_v47 = vadd.f32 %v470_v7, %v381_v0  ;;  %v506_v10 = vadd.f32 %v465_v8, %v378_v1 }
  0xc1   : > { %567 = vst [vmem:[%s913_s12 + $0xa0] sm:$0xff] %v534_v5  ;;  %568 = vst.msk [vmem:[%s913_s12 + $0xa8] sm:$0xff] %vm547_vm0, %v535_v6  ;;  %v507_v48 = vadd.f32 %v465_v8, %v379_v2 }
  0xc2   : > { %v540_v15 = vmax.f32 %v508_v9, 0.0  ;;  %v541_v16 = vmax.f32 %v509_v47, 0.0  ;;  %v538_v39 = vmax.f32 %v506_v10, 0.0 }
  0xc3   : > { %v539_v40 = vmax.f32 %v507_v48, 0.0  ;;  %v480_v17 = vpop.permute.xlu1 %479  ;;  %v475_v18 = vpop.permute.xlu0 %474 }
  0xc4   : > { %573 = vst [vmem:[%s913_s12 + $0xd0] sm:$0xff] %v540_v15  ;;  %574 = vst.msk [vmem:[%s913_s12 + $0xd8] sm:$0xff] %vm547_vm0, %v541_v16  ;;  %v512_v56 = vadd.f32 %v480_v17, %v384_v11  ;;  %v513_v19 = vadd.f32 %v480_v17, %v385_v12  ;;  %v510_v20 = vadd.f32 %v475_v18, %v382_v13 }
  0xc5   : > { %571 = vst [vmem:[%s913_s12 + $0xc0] sm:$0xff] %v538_v39  ;;  %572 = vst.msk [vmem:[%s913_s12 + $0xc8] sm:$0xff] %vm547_vm0, %v539_v40  ;;  %v511_v57 = vadd.f32 %v475_v18, %v383_v14 }
  0xc6   : > { %v544_v21 = vmax.f32 %v512_v56, 0.0  ;;  %v545_v22 = vmax.f32 %v513_v19, 0.0  ;;  %v542_v23 = vmax.f32 %v510_v20, 0.0 }
  0xc7   : > { %v543_v24 = vmax.f32 %v511_v57, 0.0 }
  0xc8   : > { %577 = vst [vmem:[%s913_s12 + $0xf0] sm:$0xff] %v544_v21  ;;  %578 = vst.msk [vmem:[%s913_s12 + $0xf8] sm:$0xff] %vm547_vm0, %v545_v22 }
  0xc9   : > { %575 = vst [vmem:[%s913_s12 + $0xe0] sm:$0xff] %v542_v23  ;;  %576 = vst.msk [vmem:[%s913_s12 + $0xe8] sm:$0xff] %vm547_vm0, %v543_v24 }
  0xca PF: > { %s13_s14 = sadd.s32 1, %s728_s14   ;;  %s1008_s12 = smov %s724_s13 }
  0xcb   : > { %p10_p5 = scmp.ge.s32.totalorder %s13_s14, 4   ;;  %s1009_s13 = smov %s1011_s15 }
  0xcd   :  { %12 = sbr.rel (!%p10_p5) target bundleno = 2 (0x2), region = 62 }

// kernel: conv2d_block.2
= control target key start
LH: loop header
LB: loop body
LE: loop exit
PB: predicated region body
PF: predicated region fallthrough
CT: control target
= control target key end

     0   :  { %s1211_s18 = smov 0   ;;  %s1534_s0 = inlined_call_operand.vmem [shape: f32[2,4,258], index: 0, kind: input, shape index: {}]   ;;  %s1535_s1 = inlined_call_operand.vmem [shape: bf16[128,36], index: 1, kind: input, shape index: {}]   ;;  %s1536_s2 = inlined_call_operand.vmem [shape: f32[1,224], index: 2, kind: input, shape index: {}]   ;;  %s1537_s3 = inlined_call_operand.vmem [shape: bf16[2,128,224], index: 3, kind: output, shape index: {0}]   ;;  %s1538_s4 = inlined_call_operand.vmem [shape: f32[2,128,1], index: 4, kind: output, shape index: {1}]   ;;  %s1539_s5 = inlined_call_operand.vmem [shape: f32[2,128,1], index: 5, kind: output, shape index: {2}]  }
   0x1 LB: > { %s1063_s19 = sadd.s32 4294967295, %s1170_s18   ;;  %p1067_p0 = scmp.ge.s32.totalorder %s1170_s18, 1  ;;  %s1170_s18 = sphi %s1211_s18, %s16_s18  }
   0x2   : > { %p192_p1 = scmp.lt.s32.totalorder %s1170_s18, 3 }
   0x4   : > { %p193_p2 = pnand %p1067_p0, %p192_p1 }
   0x5   : > { %p230_p3 = scmp.lt.s32.totalorder (!%p193_p2), %s1063_s19, 1  ;;  %vm256_vm0 = vcmask (!%p193_p2), 781312   ;;  %s1172_s24 = smov (!%p193_p2), 126   ;;  %v1180_v5 = vmov (!%p193_p2), 0   ;;  %vm270_vm1 = vcmask (!%p193_p2), 785412   ;;  %vm265_vm2 = vcmask (!%p193_p2), 1039360  }
   0x6   : > { %196 = sbr.rel (%p193_p2) target bundleno = 606 (0x25e), region = 32  ;;  %s1173_s25 = smov (!%p193_p2), 127   ;;  %510 = vmatprep.mubr.bf16.mxu0 (!%p193_p2), %v1180_v5  ;;  %550 = vmatprep.mubr.bf16.mxu1 (!%p193_p2), %v1180_v5  ;;  %vm279_vm3 = vcmask (!%p193_p2), 1031168   ;;  %vm292_vm4 = vcmask (!%p193_p2), 916480   ;;  %vm349_vm5 = vcmask (!%p193_p2), 777216   ;;  %vm305_vm6 = vcmask (!%p193_p2), 908288  }
   0x7   : > { %s1174_s26 = smov (!%p193_p2), 112   ;;  %s1175_s27 = smov (!%p193_p2), 95   ;;  %vm318_vm7 = vcmask (!%p193_p2), 900096   ;;  %vm331_vm8 = vcmask (!%p193_p2), 785408   ;;  %vm367_vm9 = vcmask (!%p193_p2), 769024   ;;  %vm471_vm10 = vcmask (!%p193_p2), 1041408  }
   0x8   : > { %s1176_s28 = smov (!%p193_p2), 111   ;;  %s1177_s29 = smov (!%p193_p2), 110   ;;  %v1156_v51 = vld [vmem:[%s1535_s1] sm:$0xff] (!%p193_p2)   ;;  %vm446_vm11 = vcmask (!%p193_p2), 293888   ;;  %v1158_v53 = vld [vmem:[%s1535_s1 + $0x8] sm:$0xff] (!%p193_p2)   ;;  %v1160_v55 = vld [vmem:[%s1535_s1 + $0x10] sm:$0xff] (!%p193_p2)   ;;  %v707_v59 = vlaneseq (!%p193_p2) }
   0x9   : > { %s1178_s30 = smov (!%p193_p2), 96   ;;  %s1179_s6 = smov (!%p193_p2), 94   ;;  %v1157_v52 = vld [vmem:[%s1535_s1 + $0x20] sm:$0xff] (!%p193_p2)   ;;  %v1159_v54 = vld [vmem:[%s1535_s1 + $0x28] sm:$0xff] (!%p193_p2)   ;;  %v1161_v56 = vld [vmem:[%s1535_s1 + $0x30] sm:$0xff] (!%p193_p2)   ;;  %vm687_vm12 = vcmask (!%p193_p2), 1043456  }
   0xa   : > { %v1162_v57 = vld [vmem:[%s1535_s1 + $0x18] sm:$0xff] (!%p193_p2)   ;;  %v708_v60 = vshrl.u32 (!%p193_p2), %v707_v59, 7  ;;  %v705_v62 = vld [vmem:[%s1536_s2] sm:$0x3] (!%p193_p2)  ;;  %vm1299_vm13 = vmor (!%p193_p2), %vm270_vm1, %vm687_vm12  ;;  %vm813_vm14 = vcmask (!%p193_p2), 7168  }
   0xb   : > { %v1163_v58 = vld [vmem:[%s1535_s1 + $0x38] sm:$0xff] (!%p193_p2)  }
   0xc   : > { %v709_v61 = vsub.s32 (!%p193_p2), 0, %v708_v60  ;;  %v713_v63 = vsub.s32 (!%p193_p2), 1, %v708_v60 }
   0xd   : > { %s1543_s19 = smov (!%p230_p3, %s1063_s19), 1 }
   0xe   : > { %s1135_s20 = smul.u32 12, %s1543_s19 }
  0x10   : > { %s1225_s23 = scalar_lea.vmem %s1534_s0, %s1135_s20 }
  0x11   : > { %v272_v0 = vld [vmem:[%s1225_s23] sm:$0xff]  ;;  %v1155_v3 = vld [vmem:[%s1225_s23 + $0x8] ss:$0 sps:$4 sm:$0xff]  }
  0x12   : > { %275 = vrot.lane.b32.xlu1 %v272_v0, %s1172_s24  ;;  %v274_v1 = vcombine.high %v272_v0, %v272_v0  ;;  %263 = vrot.lane.b32.xlu0 %v272_v0, %s1173_s25  ;;  %v260_v2 = vcombine.low %v272_v0, %v272_v0  ;;  %255 = vst [vmem:[#allocation2] sm:$0xf] %v272_v0  ;;  %v357_v4 = vld [vmem:[%s1225_s23 + $0x8] sm:$0xf] }
  0x14   : > { %257 = vst.msk [vmem:[#allocation2 + $0x8] sm:$0xf] %vm256_vm0, %v274_v1 }
  0x16   : > { %290 = vrot.lane.b32.xlu1 %v272_v0, %s1174_s26  ;;  %261 = vrot.lane.b32.xlu0 %v260_v2, %s1173_s25 }
  0x1a   : > { %277 = vrot.lane.b32.xlu1 %v274_v1, %s1172_s24  ;;  %288 = vrot.lane.b32.xlu0 %v260_v2, %s1174_s26 }
  0x1e   : > { %347 = vrot.lane.b32.xlu1 %v1155_v3, %s1175_s27  ;;  %345 = vrot.lane.b32.xlu0 %v272_v0, %s1175_s27 }
  0x22   : > { %303 = vrot.lane.b32.xlu1 %v274_v1, %s1176_s28  ;;  %301 = vrot.lane.b32.xlu0 %v272_v0, %s1176_s28 }
  0x26   : > { %316 = vrot.lane.b32.xlu1 %v272_v0, %s1177_s29  ;;  %314 = vrot.lane.b32.xlu0 %v260_v2, %s1177_s29 }
  0x2a   : > { %329 = vrot.lane.b32.xlu1 %v274_v1, %s1178_s30  ;;  %327 = vrot.lane.b32.xlu0 %v272_v0, %s1178_s30 }
  0x2e   : > { %361 = vrot.lane.b32.xlu1 %v272_v0, %s1179_s6  ;;  %343 = vrot.lane.b32.xlu0 %v260_v2, %s1175_s27  ;;  %v1285_v0 = vrot.slane %v705_v62, %v709_v61  ;;  %s1288_s27 = sshll.u32 %s1543_s19, 7 }
  0x2f   : > { %s1296_s30 = scalar_lea.vmem %s1537_s3, %s1288_s27  ;;  %s1459_s7 = scalar_lea.vmem %s1538_s4, %s1288_s27 }
  0x30   : > { %s1473_s10 = scalar_lea.vmem %s1539_s5, %s1288_s27 }
  0x32   : > { %365 = vrot.lane.b32.xlu1 %v357_v4, %s1179_s6  ;;  %363 = vrot.lane.b32.xlu0 %v274_v1, %s1179_s6  ;;  %v1290_v1 = vrot.slane %v705_v62, %v713_v63 }
  0x84   : > { %v276_v6 = vpop.permute.xlu1 %275  ;;  %v264_v7 = vpop.permute.xlu0 %263 }
  0x85   : > { %271 = vst.msk [vmem:[#allocation2 + $0x8] sm:$0xf0] %vm270_vm1, %v264_v7 }
  0x88   : > { %v291_v8 = vpop.permute.xlu1 %290  ;;  %v262_v9 = vpop.permute.xlu0 %261 }
  0x89   : > { %297 = vst.msk [vmem:[#allocation2 + $0x18] sm:$0xf0] %vm270_vm1, %v291_v8  ;;  %v266_v10 = vsel %vm265_vm2, %v262_v9, %v264_v7 }
  0x8a   : > { %269 = vst [vmem:[#allocation2] sm:$0xf0] %v266_v10 }
  0x8c   : > { %v278_v11 = vpop.permute.xlu1 %277  ;;  %v289_v12 = vpop.permute.xlu0 %288  ;;  %v375_v20 = vld [vmem:[#allocation2 + $0x8] sm:$0xff] }
  0x8d   : > { %v280_v13 = vsel %vm279_vm3, %v276_v6, %v278_v11  ;;  %284 = vst.msk [vmem:[#allocation2 + $0x18] sm:$0xf] %vm256_vm0, %v278_v11  ;;  %v293_v14 = vsel %vm292_vm4, %v289_v12, %v291_v8 }
  0x8e   : > { %283 = vst [vmem:[#allocation2 + $0x10] sm:$0xf] %v280_v13  ;;  %296 = vst [vmem:[#allocation2 + $0x10] sm:$0xf0] %v293_v14 }
  0x90   : > { %v348_v15 = vpop.permute.xlu1 %347  ;;  %v346_v16 = vpop.permute.xlu0 %345 }
  0x91   : > { %v351_v17 = vsel %vm349_vm5, %v346_v16, %v348_v15  ;;  %v374_v24 = vld [vmem:[#allocation2] sm:$0xff] }
  0x92   : > { %355 = vst.msk [vmem:[#allocation2 + $0x38] sm:$0xf0] %vm270_vm1, %v351_v17 }
  0x94   : > { %v304_v18 = vpop.permute.xlu1 %303  ;;  %v302_v19 = vpop.permute.xlu0 %301  ;;  %v377_v21 = vld [vmem:[#allocation2 + $0x18] sm:$0xff] }
  0x95   : > { %310 = vst.msk [vmem:[#allocation2 + $0x28] sm:$0xf] %vm256_vm0, %v304_v18  ;;  %v306_v22 = vsel %vm305_vm6, %v302_v19, %v304_v18  ;;  %v385_v23 = vpack.c.bf16 %v377_v21, %v375_v20  ;;  %v376_v25 = vld [vmem:[#allocation2 + $0x10] sm:$0xff] }
  0x96   : > { %309 = vst [vmem:[#allocation2 + $0x20] sm:$0xf] %v306_v22  ;;  %v384_v26 = vpack.c.bf16 %v376_v25, %v374_v24 }
  0x97   : > { %478 = vmatprep.subr.bf16.mxu0 %v385_v23  ;;  %1129 = vmatprep.subr.bf16.mxu1 %v385_v23 }
  0x98   : > { %v317_v27 = vpop.permute.xlu1 %316  ;;  %v315_v28 = vpop.permute.xlu0 %314  ;;  %479 = vmatpush1.bf16.msra.mxu0 %v384_v26  ;;  %1132 = vmatpush1.bf16.msra.mxu1 %v384_v26 }
  0x99   : > { %323 = vst.msk [vmem:[#allocation2 + $0x28] sm:$0xf0] %vm270_vm1, %v317_v27  ;;  %v319_v29 = vsel %vm318_vm7, %v315_v28, %v317_v27 }
  0x9a   : > { %322 = vst [vmem:[#allocation2 + $0x20] sm:$0xf0] %v319_v29 }
  0x9c   : > { %v330_v30 = vpop.permute.xlu1 %329  ;;  %v328_v31 = vpop.permute.xlu0 %327 }
  0x9d   : > { %336 = vst.msk [vmem:[#allocation2 + $0x38] sm:$0xf] %vm256_vm0, %v330_v30  ;;  %v332_v32 = vsel %vm331_vm8, %v328_v31, %v330_v30 }
  0x9e   : > { %335 = vst [vmem:[#allocation2 + $0x30] sm:$0xf] %v332_v32 }
  0xa0   : > { %v362_v33 = vpop.permute.xlu1 %361  ;;  %v344_v34 = vpop.permute.xlu0 %343  ;;  %v379_v38 = vld [vmem:[#allocation2 + $0x28] sm:$0xff] }
  0xa1   : > { %v350_v35 = vsel %vm349_vm5, %v344_v34, %v346_v16  ;;  %v378_v43 = vld [vmem:[#allocation2 + $0x20] sm:$0xff] }
  0xa2   : > { %354 = vst [vmem:[#allocation2 + $0x30] sm:$0xf0] %v350_v35 }
  0xa4   : > { %v366_v36 = vpop.permute.xlu1 %365  ;;  %v364_v37 = vpop.permute.xlu0 %363  ;;  %v381_v39 = vld [vmem:[#allocation2 + $0x38] sm:$0xff] }
  0xa5   : > { %v368_v40 = vsel %vm367_vm9, %v362_v33, %v364_v37  ;;  %v369_v41 = vsel %vm367_vm9, %v364_v37, %v366_v36  ;;  %v387_v42 = vpack.c.bf16 %v381_v39, %v379_v38 }
  0xa6   : > { %372 = vst [vmem:[#allocation2 + $0x40] sm:$0xf] %v368_v40  ;;  %373 = vst.msk [vmem:[#allocation2 + $0x48] sm:$0xf] %vm256_vm0, %v369_v41 }
  0xa7   : > { %480 = vmatprep.subr.bf16.mxu0 %v387_v42  ;;  %1130 = vmatprep.subr.bf16.mxu1 %v387_v42 }
  0xa9   : > { %v380_v44 = vld [vmem:[#allocation2 + $0x30] sm:$0xff] }
  0xaa   : > { %v386_v45 = vpack.c.bf16 %v380_v44, %v378_v43 }
  0xac   : > { %481 = vmatpush1.bf16.msra.mxu0 %v386_v45  ;;  %1133 = vmatpush1.bf16.msra.mxu1 %v386_v45 }
  0xad   : > { %v383_v46 = vld [vmem:[#allocation2 + $0x48] sm:$0xf]  ;;  %v382_v47 = vld [vmem:[#allocation2 + $0x40] sm:$0xf] }
  0xae   : > { %v389_v48 = vpack.c.bf16 %v383_v46, %v383_v46  ;;  %v388_v49 = vpack.c.bf16 %v382_v47, %v382_v47 }
  0xb0   : > { %1083 = vmatprep.subr.msk.bf16.mxu0 %vm471_vm10, %v389_v48  ;;  %1131 = vmatprep.subr.msk.bf16.mxu1 %vm471_vm10, %v389_v48  ;;  %v473_v50 = vsel %vm471_vm10, %v388_v49, 0 }
  0xb1   : > { %483 = vmatpush1.bf16.msra.mxu0 %v473_v50  ;;  %1134 = vmatpush1.bf16.msra.mxu1 %v473_v50 }
  0xb4   : > { %1084 = vmatmul.mubr.msk.bf16.vlgmr.msra.gmra.mrb[0].mxu0 %vm446_vm11, %v1156_v51  ;;  %1088 = vmatmul.mubr.msk.bf16.vlgmr.msra.gmra.mrb[0].mxu1 %vm446_vm11, %v1157_v52 }
  0xb5   : > { %520 = vmatprep.mubr.bf16.mxu0 %v1180_v5  ;;  %560 = vmatprep.mubr.bf16.mxu1 %v1180_v5 }
  0xbc   : > { %1085 = vmatmul.mubr.msk.bf16.gmra.mrb[4].mxu0 %vm446_vm11, %v1158_v53  ;;  %1089 = vmatmul.mubr.msk.bf16.gmra.mrb[4].mxu1 %vm446_vm11, %v1159_v54 }
  0xbd   : > { %530 = vmatprep.mubr.bf16.mxu0 %v1180_v5  ;;  %570 = vmatprep.mubr.bf16.mxu1 %v1180_v5 }
  0xc4   : > { %1086 = vmatmul.mubr.msk.bf16.gmra.mrb[8].mxu0 %vm446_vm11, %v1160_v55  ;;  %1090 = vmatmul.mubr.msk.bf16.gmra.mrb[8].mxu1 %vm446_vm11, %v1161_v56 }
  0xc5   : > { %540 = vmatprep.mubr.bf16.mxu0 %v1180_v5  ;;  %580 = vmatprep.mubr.bf16.mxu1 %v1180_v5 }
  0xcc   : > { %1087 = vmatmul.mubr.msk.bf16.gmra.mrb[12].mxu0 %vm446_vm11, %v1162_v57  ;;  %1091 = vmatmul.mubr.msk.bf16.gmra.mrb[12].mxu1 %vm446_vm11, %v1163_v58 }
 0x187   : > { %v512_v2 = vpop.f32.mrb[0].mxu0  ;;  %v552_v3 = vpop.f32.mrb[0].mxu1 }
 0x188   : > { %v717_v5 = vmul.f32 %v1285_v0, %v512_v2  ;;  %v733_v6 = vmul.f32 %v1285_v0, %v552_v3  ;;  %v514_v7 = vpop.f32.mrb[1].mxu0  ;;  %v554_v8 = vpop.f32.mrb[1].mxu1 }
 0x189   : > { %v1113_v9 = vpack.c.bf16 %v514_v7, %v512_v2  ;;  %v718_v10 = vmul.f32 %v1290_v1, %v514_v7  ;;  %v1121_v11 = vpack.c.bf16 %v554_v8, %v552_v3  ;;  %v734_v12 = vmul.f32 %v1290_v1, %v554_v8  ;;  %v516_v13 = vpop.f32.mrb[2].mxu0  ;;  %v556_v14 = vpop.f32.mrb[2].mxu1 }
 0x18a   : > { %v719_v15 = vmul.f32 %v1285_v0, %v516_v13  ;;  %v735_v16 = vmul.f32 %v1285_v0, %v556_v14  ;;  %v518_v17 = vpop.f32.mrb[3].mxu0  ;;  %v558_v18 = vpop.f32.mrb[3].mxu1  ;;  %v830_v19 = vmul.f32 %v717_v5, %v717_v5  ;;  %v846_v20 = vmul.f32 %v733_v6, %v733_v6 }
 0x18b   : > { %689 = vst.msk [vmem:[%s1296_s30] sm:$0xff] %vm1299_vm13, %v1113_v9  ;;  %v831_v21 = vmul.f32 %v718_v10, %v718_v10  ;;  %697 = vst.msk [vmem:[%s1296_s30 + $0x40] sm:$0xff] %vm1299_vm13, %v1121_v11  ;;  %v847_v22 = vmul.f32 %v734_v12, %v734_v12  ;;  %v1114_v23 = vpack.c.bf16 %v518_v17, %v516_v13  ;;  %v781_v27 = vsel %vm331_vm8, %v734_v12, 0.0 }
 0x18c   : > { %v720_v24 = vmul.f32 %v1290_v1, %v518_v17  ;;  %v1122_v25 = vpack.c.bf16 %v558_v18, %v556_v14  ;;  %v736_v26 = vmul.f32 %v1290_v1, %v558_v18  ;;  %v749_v28 = vsel %vm331_vm8, %v718_v10, 0.0 }
 0x18d   : > { %690 = vst.msk [vmem:[%s1296_s30 + $0x8] sm:$0xff] %vm1299_vm13, %v1114_v23  ;;  %v782_v30 = vadd.f32 %v781_v27, %v733_v6  ;;  %v750_v31 = vadd.f32 %v749_v28, %v717_v5  ;;  %v832_v36 = vmul.f32 %v719_v15, %v719_v15  ;;  %v862_v40 = vsel %vm331_vm8, %v831_v21, 0.0 }
 0x18e   : > { %v833_v29 = vmul.f32 %v720_v24, %v720_v24  ;;  %v753_v32 = vsel %vm331_vm8, %v720_v24, 0.0  ;;  %698 = vst.msk [vmem:[%s1296_s30 + $0x48] sm:$0xff] %vm1299_vm13, %v1122_v25  ;;  %v849_v33 = vmul.f32 %v736_v26, %v736_v26  ;;  %v785_v34 = vsel %vm331_vm8, %v736_v26, 0.0 }
 0x18f   : > { %v754_v35 = vadd.f32 %v753_v32, %v719_v15  ;;  %783 = vadd.xlane.f32.xlu1 %v782_v30  ;;  %751 = vadd.xlane.f32.xlu0 %v750_v31  ;;  %v786_v37 = vadd.f32 %v785_v34, %v735_v16  ;;  %v522_v38 = vpop.f32.mrb[4].mxu0  ;;  %v562_v41 = vpop.f32.mrb[4].mxu1  ;;  %v848_v42 = vmul.f32 %v735_v16, %v735_v16  ;;  %v894_v58 = vsel %vm331_vm8, %v847_v22, 0.0 }
 0x190   : > { %v866_v39 = vsel %vm331_vm8, %v833_v29, 0.0  ;;  %v721_v43 = vmul.f32 %v1285_v0, %v522_v38  ;;  %v524_v44 = vpop.f32.mrb[5].mxu0  ;;  %v863_v46 = vadd.f32 %v862_v40, %v830_v19  ;;  %v737_v47 = vmul.f32 %v1285_v0, %v562_v41  ;;  %v564_v48 = vpop.f32.mrb[5].mxu1 }
 0x191   : > { %v867_v45 = vadd.f32 %v866_v39, %v832_v36  ;;  %v1115_v49 = vpack.c.bf16 %v524_v44, %v522_v38  ;;  %v722_v50 = vmul.f32 %v1290_v1, %v524_v44  ;;  %v526_v51 = vpop.f32.mrb[6].mxu0  ;;  %v1123_v52 = vpack.c.bf16 %v564_v48, %v562_v41  ;;  %v566_v54 = vpop.f32.mrb[6].mxu1 }
 0x192   : > { %v738_v53 = vmul.f32 %v1290_v1, %v564_v48  ;;  %v723_v55 = vmul.f32 %v1285_v0, %v526_v51  ;;  %v528_v56 = vpop.f32.mrb[7].mxu0  ;;  %v898_v57 = vsel %vm331_vm8, %v849_v33, 0.0  ;;  %v1337_v59 = vmul.f32 %v1285_v0, %v566_v54  ;;  %v568_v60 = vpop.f32.mrb[7].mxu1 }
 0x193   : > { %787 = vadd.xlane.f32.xlu0 %v786_v37  ;;  %755 = vadd.xlane.f32.xlu1 %v754_v35  ;;  %691 = vst.msk [vmem:[%s1296_s30 + $0x10] sm:$0xff] %vm1299_vm13, %v1115_v49  ;;  %v835_v61 = vmul.f32 %v722_v50, %v722_v50  ;;  %v1116_v62 = vpack.c.bf16 %v528_v56, %v526_v51  ;;  %699 = vst.msk [vmem:[%s1296_s30 + $0x50] sm:$0xff] %vm1299_vm13, %v1123_v52  ;;  %v757_v11 = vsel %vm331_vm8, %v722_v50, 0.0 }
 0x194   : > { %v724_v63 = vmul.f32 %v1290_v1, %v528_v56  ;;  %v789_v2 = vsel %vm331_vm8, %v738_v53, 0.0  ;;  %v851_v3 = vmul.f32 %v738_v53, %v738_v53  ;;  %v899_v5 = vadd.f32 %v898_v57, %v848_v42 }
 0x195   : > { %v895_v6 = vadd.f32 %v894_v58, %v846_v20  ;;  %v1124_v7 = vpack.c.bf16 %v568_v60, %v566_v54  ;;  %692 = vst.msk [vmem:[%s1296_s30 + $0x18] sm:$0xff] %vm1299_vm13, %v1116_v62  ;;  %v740_v9 = vmul.f32 %v1290_v1, %v568_v60  ;;  %v790_v10 = vadd.f32 %v789_v2, %v737_v47 }
 0x196   : > { %v837_v8 = vmul.f32 %v724_v63, %v724_v63  ;;  %v758_v12 = vadd.f32 %v757_v11, %v721_v43  ;;  %v834_v13 = vmul.f32 %v721_v43, %v721_v43  ;;  %v870_v14 = vsel %vm331_vm8, %v835_v61, 0.0 }
 0x197   : > { %700 = vst.msk [vmem:[%s1296_s30 + $0x58] sm:$0xff] %vm1299_vm13, %v1124_v7  ;;  %v761_v15 = vsel %vm331_vm8, %v724_v63, 0.0  ;;  %868 = vadd.xlane.f32.xlu0 %v867_v45  ;;  %864 = vadd.xlane.f32.xlu1 %v863_v46  ;;  %v853_v16 = vmul.f32 %v740_v9, %v740_v9  ;;  %v532_v18 = vpop.f32.mrb[8].mxu0  ;;  %v850_v19 = vmul.f32 %v737_v47, %v737_v47  ;;  %v902_v20 = vsel %vm331_vm8, %v851_v3, 0.0  ;;  %v572_v21 = vpop.f32.mrb[8].mxu1 }
 0x198   : > { %v1357_v17 = vadd.f32 %v761_v15, %v723_v55  ;;  %v1360_v22 = vadd.f32 %v870_v14, %v834_v13  ;;  %v725_v23 = vmul.f32 %v1285_v0, %v532_v18  ;;  %v534_v24 = vpop.f32.mrb[9].mxu0  ;;  %v793_v25 = vsel %vm331_vm8, %v740_v9, 0.0  ;;  %v574_v27 = vpop.f32.mrb[9].mxu1 }
 0x199   : > { %v741_v26 = vmul.f32 %v1285_v0, %v572_v21  ;;  %v1117_v28 = vpack.c.bf16 %v534_v24, %v532_v18  ;;  %v726_v29 = vmul.f32 %v1290_v1, %v534_v24  ;;  %v1366_v30 = vadd.f32 %v902_v20, %v850_v19  ;;  %v536_v32 = vpop.f32.mrb[10].mxu0  ;;  %v576_v33 = vpop.f32.mrb[10].mxu1 }
 0x19a   : > { %v1369_v31 = vadd.f32 %v793_v25, %v1337_v59  ;;  %v1372_v34 = vmul.f32 %v1285_v0, %v536_v32  ;;  %v538_v35 = vpop.f32.mrb[11].mxu0  ;;  %v1125_v36 = vpack.c.bf16 %v574_v27, %v572_v21  ;;  %v742_v37 = vmul.f32 %v1290_v1, %v574_v27  ;;  %v578_v39 = vpop.f32.mrb[11].mxu1 }
 0x19b   : > { %v836_v38 = vmul.f32 %v723_v55, %v723_v55  ;;  %900 = vadd.xlane.f32.xlu0 %v899_v5  ;;  %896 = vadd.xlane.f32.xlu1 %v895_v6  ;;  %693 = vst.msk [vmem:[%s1296_s30 + $0x20] sm:$0xff] %vm1299_vm13, %v1117_v28  ;;  %v839_v40 = vmul.f32 %v726_v29, %v726_v29  ;;  %v874_v43 = vsel %vm331_vm8, %v837_v8, 0.0  ;;  %v765_v46 = vsel %vm331_vm8, %v726_v29, 0.0 }
 0x19c   : > { %v1118_v41 = vpack.c.bf16 %v538_v35, %v536_v32  ;;  %v728_v42 = vmul.f32 %v1290_v1, %v538_v35  ;;  %701 = vst.msk [vmem:[%s1296_s30 + $0x60] sm:$0xff] %vm1299_vm13, %v1125_v36  ;;  %v855_v44 = vmul.f32 %v742_v37, %v742_v37  ;;  %v743_v47 = vmul.f32 %v1285_v0, %v576_v33 }
 0x19d   : > { %v1383_v45 = vadd.f32 %v874_v43, %v836_v38  ;;  %v1390_v49 = vadd.f32 %v765_v46, %v725_v23  ;;  %v1126_v50 = vpack.c.bf16 %v578_v39, %v576_v33  ;;  %v744_v51 = vmul.f32 %v1290_v1, %v578_v39 }
 0x19e   : > { %694 = vst.msk [vmem:[%s1296_s30 + $0x28] sm:$0xff] %vm1299_vm13, %v1118_v41  ;;  %v841_v48 = vmul.f32 %v728_v42, %v728_v42  ;;  %v852_v52 = vmul.f32 %v1337_v59, %v1337_v59  ;;  %v906_v53 = vsel %vm331_vm8, %v853_v16, 0.0  ;;  %v797_v54 = vsel %vm331_vm8, %v742_v37, 0.0 }
 0x19f   : > { %v838_v55 = vmul.f32 %v725_v23, %v725_v23  ;;  %791 = vadd.xlane.f32.xlu1 %v790_v10  ;;  %759 = vadd.xlane.f32.xlu0 %v758_v12  ;;  %702 = vst.msk [vmem:[%s1296_s30 + $0x68] sm:$0xff] %vm1299_vm13, %v1126_v50  ;;  %v857_v56 = vmul.f32 %v744_v51, %v744_v51  ;;  %v878_v58 = vsel %vm331_vm8, %v839_v40, 0.0  ;;  %v769_v60 = vsel %vm331_vm8, %v728_v42, 0.0  ;;  %v542_v61 = vpop.f32.mrb[12].mxu0  ;;  %v582_v62 = vpop.f32.mrb[12].mxu1 }
 0x1a0   : > { %v1400_v57 = vadd.f32 %v797_v54, %v741_v26  ;;  %v1404_v59 = vadd.f32 %v906_v53, %v852_v52  ;;  %v1409_v2 = vadd.f32 %v769_v60, %v1372_v34  ;;  %v729_v3 = vmul.f32 %v1285_v0, %v542_v61  ;;  %v544_v5 = vpop.f32.mrb[13].mxu0  ;;  %v584_v6 = vpop.f32.mrb[13].mxu1 }
 0x1a1   : > { %v1406_v63 = vadd.f32 %v878_v58, %v838_v55  ;;  %v1119_v7 = vpack.c.bf16 %v544_v5, %v542_v61  ;;  %v730_v8 = vmul.f32 %v1290_v1, %v544_v5  ;;  %v854_v9 = vmul.f32 %v741_v26, %v741_v26  ;;  %v546_v11 = vpop.f32.mrb[14].mxu0  ;;  %v586_v12 = vpop.f32.mrb[14].mxu1 }
 0x1a2   : > { %v910_v10 = vsel %vm331_vm8, %v855_v44, 0.0  ;;  %v801_v13 = vsel %vm331_vm8, %v744_v51, 0.0  ;;  %v731_v14 = vmul.f32 %v1285_v0, %v546_v11  ;;  %v745_v15 = vmul.f32 %v1285_v0, %v582_v62  ;;  %v548_v16 = vpop.f32.mrb[15].mxu0  ;;  %v588_v19 = vpop.f32.mrb[15].mxu1 }
 0x1a3   : > { %v1127_v18 = vpack.c.bf16 %v584_v6, %v582_v62  ;;  %872 = vadd.xlane.f32.xlu1 %v1360_v22  ;;  %763 = vadd.xlane.f32.xlu0 %v1357_v17  ;;  %695 = vst.msk [vmem:[%s1296_s30 + $0x30] sm:$0xff] %vm1299_vm13, %v1119_v7  ;;  %v843_v20 = vmul.f32 %v730_v8, %v730_v8  ;;  %v882_v24 = vsel %vm331_vm8, %v841_v48, 0.0  ;;  %v773_v27 = vsel %vm331_vm8, %v730_v8, 0.0 }
 0x1a4   : > { %v911_v21 = vadd.f32 %v910_v10, %v854_v9  ;;  %v802_v23 = vadd.f32 %v801_v13, %v743_v47  ;;  %v1120_v25 = vpack.c.bf16 %v548_v16, %v546_v11  ;;  %v732_v26 = vmul.f32 %v1290_v1, %v548_v16 }
 0x1a5   : > { %703 = vst.msk [vmem:[%s1296_s30 + $0x70] sm:$0xff] %vm1299_vm13, %v1127_v18  ;;  %v746_v22 = vmul.f32 %v1290_v1, %v584_v6  ;;  %v840_v17 = vmul.f32 %v1372_v34, %v1372_v34  ;;  %v747_v28 = vmul.f32 %v1285_v0, %v586_v12  ;;  %v1128_v29 = vpack.c.bf16 %v588_v19, %v586_v12 }
 0x1a6   : > { %v748_v32 = vmul.f32 %v1290_v1, %v588_v19  ;;  %696 = vst.msk [vmem:[%s1296_s30 + $0x38] sm:$0xff] %vm1299_vm13, %v1120_v25  ;;  %v845_v33 = vmul.f32 %v732_v26, %v732_v26  ;;  %v774_v37 = vadd.f32 %v773_v27, %v729_v3  ;;  %v856_v38 = vmul.f32 %v743_v47, %v743_v47 }
 0x1a7   : > { %v859_v35 = vmul.f32 %v746_v22, %v746_v22  ;;  %v883_v36 = vadd.f32 %v882_v24, %v840_v17  ;;  %904 = vadd.xlane.f32.xlu1 %v1366_v30  ;;  %795 = vadd.xlane.f32.xlu0 %v1369_v31  ;;  %704 = vst.msk [vmem:[%s1296_s30 + $0x78] sm:$0xff] %vm1299_vm13, %v1128_v29  ;;  %v914_v0 = vsel %vm331_vm8, %v857_v56, 0.0  ;;  %v805_v1 = vsel %vm331_vm8, %v746_v22, 0.0 }
 0x1a8   : > { %v861_v34 = vmul.f32 %v748_v32, %v748_v32  ;;  %v806_v39 = vadd.f32 %v805_v1, %v745_v15  ;;  %v842_v40 = vmul.f32 %v729_v3, %v729_v3  ;;  %v886_v41 = vsel %vm331_vm8, %v843_v20, 0.0 }
 0x1a9   : > { %v777_v42 = vsel %vm331_vm8, %v732_v26, 0.0  ;;  %v915_v43 = vadd.f32 %v914_v0, %v856_v38  ;;  %v858_v30 = vmul.f32 %v745_v15, %v745_v15  ;;  %v918_v31 = vsel %vm331_vm8, %v859_v35, 0.0 }
 0x1aa   : > { %v778_v44 = vadd.f32 %v777_v42, %v731_v14  ;;  %v887_v46 = vadd.f32 %v886_v41, %v842_v40  ;;  %v809_v4 = vsel %vm331_vm8, %v748_v32, 0.0  ;;  %v844_v48 = vmul.f32 %v731_v14, %v731_v14 }
 0x1ab   : > { %v890_v47 = vsel %vm331_vm8, %v845_v33, 0.0  ;;  %876 = vadd.xlane.f32.xlu0 %v1383_v45  ;;  %767 = vadd.xlane.f32.xlu1 %v1390_v49  ;;  %v919_v50 = vadd.f32 %v918_v31, %v858_v30  ;;  %v810_v51 = vadd.f32 %v809_v4, %v747_v28  ;;  %v860_v52 = vmul.f32 %v747_v28, %v747_v28 }
 0x1ac   : > { %v922_v53 = vsel %vm331_vm8, %v861_v34, 0.0  ;;  %v891_v54 = vadd.f32 %v890_v47, %v844_v48 }
 0x1ad   : > { %v923_v55 = vadd.f32 %v922_v53, %v860_v52 }
 0x1af   : > { %908 = vadd.xlane.f32.xlu0 %v1404_v59  ;;  %799 = vadd.xlane.f32.xlu1 %v1400_v57 }
 0x1b3   : > { %880 = vadd.xlane.f32.xlu1 %v1406_v63  ;;  %771 = vadd.xlane.f32.xlu0 %v1409_v2 }
 0x1b7   : > { %912 = vadd.xlane.f32.xlu1 %v911_v21  ;;  %803 = vadd.xlane.f32.xlu0 %v802_v23 }
 0x1bb   : > { %884 = vadd.xlane.f32.xlu0 %v883_v36  ;;  %775 = vadd.xlane.f32.xlu1 %v774_v37 }
 0x1bf   : > { %916 = vadd.xlane.f32.xlu0 %v915_v43  ;;  %807 = vadd.xlane.f32.xlu1 %v806_v39 }
 0x1c3   : > { %888 = vadd.xlane.f32.xlu1 %v887_v46  ;;  %779 = vadd.xlane.f32.xlu0 %v778_v44 }
 0x1c7   : > { %920 = vadd.xlane.f32.xlu1 %v919_v50  ;;  %811 = vadd.xlane.f32.xlu0 %v810_v51 }
 0x1cb   : > { %892 = vadd.xlane.f32.xlu0 %v891_v54 }
 0x1cf   : > { %924 = vadd.xlane.f32.xlu0 %v923_v55 }
 0x21c   : > { %v784_v45 = vpop.xlane.xlu1 %783  ;;  %v752_v49 = vpop.xlane.xlu0 %751 }
 0x21d   : > { %822 = vst.msk [vmem:[%s1459_s7 + $0x40] sm:$0xff] %vm813_vm14, %v784_v45  ;;  %814 = vst.msk [vmem:[%s1459_s7] sm:$0xff] %vm813_vm14, %v752_v49 }
 0x220   : > { %v788_v56 = vpop.xlane.xlu0 %787  ;;  %v756_v57 = vpop.xlane.xlu1 %755 }
 0x221   : > { %823 = vst.msk [vmem:[%s1459_s7 + $0x48] sm:$0xff] %vm813_vm14, %v788_v56  ;;  %815 = vst.msk [vmem:[%s1459_s7 + $0x8] sm:$0xff] %vm813_vm14, %v756_v57 }
 0x224   : > { %v869_v58 = vpop.xlane.xlu0 %868  ;;  %v865_v60 = vpop.xlane.xlu1 %864 }
 0x225   : > { %927 = vst.msk [vmem:[%s1473_s10 + $0x8] sm:$0xff] %vm813_vm14, %v869_v58  ;;  %926 = vst.msk [vmem:[%s1473_s10] sm:$0xff] %vm813_vm14, %v865_v60 }
 0x228   : > { %v901_v61 = vpop.xlane.xlu0 %900  ;;  %v897_v62 = vpop.xlane.xlu1 %896 }
 0x229   : > { %935 = vst.msk [vmem:[%s1473_s10 + $0x48] sm:$0xff] %vm813_vm14, %v901_v61  ;;  %934 = vst.msk [vmem:[%s1473_s10 + $0x40] sm:$0xff] %vm813_vm14, %v897_v62 }
 0x22c   : > { %v792_v59 = vpop.xlane.xlu1 %791  ;;  %v760_v63 = vpop.xlane.xlu0 %759 }
 0x22d   : > { %824 = vst.msk [vmem:[%s1459_s7 + $0x50] sm:$0xff] %vm813_vm14, %v792_v59  ;;  %816 = vst.msk [vmem:[%s1459_s7 + $0x10] sm:$0xff] %vm813_vm14, %v760_v63 }
 0x230   : > { %v873_v2 = vpop.xlane.xlu1 %872  ;;  %v764_v3 = vpop.xlane.xlu0 %763 }
 0x231   : > { %928 = vst.msk [vmem:[%s1473_s10 + $0x10] sm:$0xff] %vm813_vm14, %v873_v2  ;;  %817 = vst.msk [vmem:[%s1459_s7 + $0x18] sm:$0xff] %vm813_vm14, %v764_v3 }
 0x234   : > { %v905_v5 = vpop.xlane.xlu1 %904  ;;  %v796_v6 = vpop.xlane.xlu0 %795 }
 0x235   : > { %936 = vst.msk [vmem:[%s1473_s10 + $0x50] sm:$0xff] %vm813_vm14, %v905_v5  ;;  %825 = vst.msk [vmem:[%s1459_s7 + $0x58] sm:$0xff] %vm813_vm14, %v796_v6 }
 0x238   : > { %v877_v7 = vpop.xlane.xlu0 %876  ;;  %v768_v8 = vpop.xlane.xlu1 %767 }
 0x239   : > { %929 = vst.msk [vmem:[%s1473_s10 + $0x18] sm:$0xff] %vm813_vm14, %v877_v7  ;;  %818 = vst.msk [vmem:[%s1459_s7 + $0x20] sm:$0xff] %vm813_vm14, %v768_v8 }
 0x23c   : > { %v909_v9 = vpop.xlane.xlu0 %908  ;;  %v800_v10 = vpop.xlane.xlu1 %799 }
 0x23d   : > { %937 = vst.msk [vmem:[%s1473_s10 + $0x58] sm:$0xff] %vm813_vm14, %v909_v9  ;;  %826 = vst.msk [vmem:[%s1459_s7 + $0x60] sm:$0xff] %vm813_vm14, %v800_v10 }
 0x240   : > { %v881_v11 = vpop.xlane.xlu1 %880  ;;  %v772_v12 = vpop.xlane.xlu0 %771 }
 0x241   : > { %930 = vst.msk [vmem:[%s1473_s10 + $0x20] sm:$0xff] %vm813_vm14, %v881_v11  ;;  %819 = vst.msk [vmem:[%s1459_s7 + $0x28] sm:$0xff] %vm813_vm14, %v772_v12 }
 0x244   : > { %v913_v13 = vpop.xlane.xlu1 %912  ;;  %v804_v14 = vpop.xlane.xlu0 %803 }
 0x245   : > { %938 = vst.msk [vmem:[%s1473_s10 + $0x60] sm:$0xff] %vm813_vm14, %v913_v13  ;;  %827 = vst.msk [vmem:[%s1459_s7 + $0x68] sm:$0xff] %vm813_vm14, %v804_v14 }
 0x248   : > { %v885_v15 = vpop.xlane.xlu0 %884  ;;  %v776_v16 = vpop.xlane.xlu1 %775 }
 0x249   : > { %931 = vst.msk [vmem:[%s1473_s10 + $0x28] sm:$0xff] %vm813_vm14, %v885_v15  ;;  %820 = vst.msk [vmem:[%s1459_s7 + $0x30] sm:$0xff] %vm813_vm14, %v776_v16 }
 0x24c   : > { %v917_v18 = vpop.xlane.xlu0 %916  ;;  %v808_v19 = vpop.xlane.xlu1 %807 }
 0x24d   : > { %939 = vst.msk [vmem:[%s1473_s10 + $0x68] sm:$0xff] %vm813_vm14, %v917_v18  ;;  %828 = vst.msk [vmem:[%s1459_s7 + $0x70] sm:$0xff] %vm813_vm14, %v808_v19 }
 0x250   : > { %v889_v20 = vpop.xlane.xlu1 %888  ;;  %v780_v21 = vpop.xlane.xlu0 %779 }
 0x251   : > { %932 = vst.msk [vmem:[%s1473_s10 + $0x30] sm:$0xff] %vm813_vm14, %v889_v20  ;;  %821 = vst.msk [vmem:[%s1459_s7 + $0x38] sm:$0xff] %vm813_vm14, %v780_v21 }
 0x254   : > { %v921_v23 = vpop.xlane.xlu1 %920  ;;  %v812_v24 = vpop.xlane.xlu0 %811 }
 0x255   : > { %940 = vst.msk [vmem:[%s1473_s10 + $0x70] sm:$0xff] %vm813_vm14, %v921_v23  ;;  %829 = vst.msk [vmem:[%s1459_s7 + $0x78] sm:$0xff] %vm813_vm14, %v812_v24 }
 0x258   : > { %v893_v25 = vpop.xlane.xlu0 %892 }
 0x259   : > { %933 = vst.msk [vmem:[%s1473_s10 + $0x38] sm:$0xff] %vm813_vm14, %v893_v25 }
 0x25c   : > { %v925_v26 = vpop.xlane.xlu0 %924 }
 0x25d   : > { %941 = vst.msk [vmem:[%s1473_s10 + $0x78] sm:$0xff] %vm813_vm14, %v925_v26 }
 0x25e PF: > { %s16_s18 = sadd.s32 1, %s1170_s18  }
 0x25f   : > { %p13_p4 = scmp.ge.s32.totalorder %s16_s18, 4  }
 0x261   :  { %15 = sbr.rel (!%p13_p4) target bundleno = 1 (0x1), region = 86 }

</bundles_post_ra>
